<compile_context>
chip_gen: v7x
topology: tpu7x:2x2x1
jax: 0.10.0
libtpu: 0.0.40
codegen_flags: <defaults>
</compile_context>

<pallas_src>
import functools

import jax
import jax.numpy as jnp
from jax.experimental import pallas as pl
from jax.experimental.pallas import tpu as pltpu


def _point_transformer_kernel(
    qa_ref, p1q_ref, ka_ref, p1k_ref, vb_ref,
    w_cat_ref, aw2_ref,
    out_ref,
    m_scr, l_scr, acc_scr,
    *, mxu_dtype,
):
    # Grid = (batch, query-tile i, neighbor-tile j); j is the reduction axis.
    j = pl.program_id(2)

    @pl.when(j == 0)
    def _():
        m_scr[...] = jnp.full_like(m_scr, -jnp.inf)
        l_scr[...] = jnp.zeros_like(l_scr)
        acc_scr[...] = jnp.zeros_like(acc_scr)

    qa = qa_ref[0]      # (TQ, E)  = x @ (wq @ aw1) + pb2 @ aw1 + ab1
    p1q = p1q_ref[0]    # (TQ, H)  = pos @ pw1 + pb1
    ka = ka_ref[0]      # (TK, E)  = x @ (wk @ aw1)
    p1k = p1k_ref[0]    # (TK, H)  = pos @ pw1
    vb = vb_ref[0]      # (TK, D)  = x @ wv + pb2

    tq, h = p1q.shape
    tk, d = vb.shape
    e = qa.shape[1]

    # relu(rel_pos @ pw1 + pb1) for this (i, j) tile, built from per-point p1
    # (no (., 3) MXU matmul, no (N, N, 3) tensor).
    relu_h = jnp.maximum(p1q[:, None, :] - p1k[None, :, :], 0.0)   # (TQ, TK, H)
    # tk % 8 == 0 keeps this reshape a pure layout no-op (no VMEM copy).
    relu_h2 = relu_h.reshape(tq * tk, h).astype(mxu_dtype)

    # One fused MXU pass over the big operand:
    #   relu_h @ [pw2 | pw2 @ aw1] -> [rel_pos_emb | attn-L1 positional term]
    fused = jnp.dot(relu_h2, w_cat_ref[...].astype(mxu_dtype),
                    preferred_element_type=jnp.float32)            # (TQ*TK, D+E)
    rpe = fused[:, :d].reshape(tq, tk, d)                          # pos-emb L2
    pa = fused[:, d:].reshape(tq, tk, e)                           # relu_h @ (pw2@aw1)

    # Positional-embedding layer 2 (pb2 already folded into vb / qa).
    v_full = vb[None, :, :] + rpe                                  # (TQ, TK, D)

    # Attention-MLP layer 1 via linearity:
    #   (qk_rel + rpe) @ aw1 + ab1 == qa[i] - ka[j] + relu_h @ (pw2 @ aw1)
    ah = jnp.maximum(qa[:, None, :] - ka[None, :, :] + pa, 0.0)    # (TQ, TK, E)
    sim = jnp.dot(ah.reshape(tq * tk, e).astype(mxu_dtype),
                  aw2_ref[...].astype(mxu_dtype),
                  preferred_element_type=jnp.float32).reshape(tq, tk, d)
    # NOTE: ab2 is constant along the neighbor (softmax) axis, so it cancels in
    # the softmax -> it is not passed to the kernel at all.

    # Online per-channel softmax over the neighbor axis (axis=1); stats in f32.
    m_prev = m_scr[...]                                            # (TQ, D)
    m_new = jnp.maximum(m_prev, jnp.max(sim, axis=1))              # (TQ, D)
    alpha = jnp.exp(m_prev - m_new)                                # (TQ, D)
    p = jnp.exp(sim - m_new[:, None, :])                           # (TQ, TK, D)
    l_scr[...] = alpha * l_scr[...] + jnp.sum(p, axis=1)
    acc_scr[...] = alpha * acc_scr[...] + jnp.sum(p * v_full, axis=1)
    m_scr[...] = m_new

    @pl.when(j == pl.num_programs(2) - 1)
    def _():
        inv_l = pl.reciprocal(l_scr[...], approx=True)             # EUP divide
        out_ref[0] = (acc_scr[...] * inv_l).astype(out_ref.dtype)


def _vmem_limit_bytes():
    """Generation-aware VMEM budget (v7x: 64 MiB/TC; v5e/v6e: 128 MiB)."""
    cap = 128 * 1024 * 1024
    try:
        cap = int(getattr(pltpu.get_tpu_info(), "vmem_capacity_bytes", cap))
    except Exception:  # non-TPU tracing / interpret fallback
        pass
    return min(max(cap * 3 // 4, 32 * 1024 * 1024), 100 * 1024 * 1024)


def point_transformer_layer(x, pos, params, *, tq=None, tk=None,
                            mxu_dtype=jnp.float32):
    """x: (B, N, D) f32, pos: (B, N, 3) f32 -> (B, N, D) f32.

    mxu_dtype: dtype for the per-pair MXU operands (jnp.bfloat16 recommended on
    v5e/v6e/v7x; accumulation and softmax stats stay f32 regardless).
    """
    B, N, D = x.shape
    (wq, wk, wv, pw1, pb1, pw2, pb2, aw1, ab1, aw2, ab2) = params
    del ab2  # constant along the softmax axis -> no effect on the output
    H = pw1.shape[1]
    E = aw1.shape[1]

    # Tile sizes: tuned per generation in production (e.g. 128x128 bf16 keeps
    # the per-pair (TQ, TK, max(D, E)) intermediates well under v7x's 64 MiB;
    # v5e/v6e can afford tk=256 with bf16 operands).
    if tq is None:
        tq = min(N, 128)
    if tk is None:
        tk = min(N, 128)
    assert N % tq == 0 and N % tk == 0, "N must be divisible by tile sizes"
    # TODO(synk): pad N to a tile multiple for ragged point counts.

    # Per-point projections hoisted out of the N^2 pairwise space (linearity),
    # with the attn-L1 weight folded into the q/k projections and all biases
    # folded so the kernel needs no bias epilogue at all.
    qa = x @ (wq @ aw1) + (pb2 @ aw1)[0] + ab1[0]   # (B, N, E)
    ka = x @ (wk @ aw1)                             # (B, N, E)
    vb = x @ wv + pb2[0]                            # (B, N, D)
    p1 = pos @ pw1                                  # (B, N, H)
    p1q = p1 + pb1[0]                               # pb1 folded into query side
    p1k = p1
    # Fuse pos-emb L2 and its attn-L1 image into one (H, D+E) weight so the
    # big relu_h operand hits the MXU once per tile.
    w_cat = jnp.concatenate([pw2, pw2 @ aw1], axis=1)   # (H, D + E)

    grid = (B, N // tq, N // tk)

    def q_spec(width):   # query-tile inputs: constant along j (stay resident)
        return pl.BlockSpec((1, tq, width), lambda b, i, j: (b, i, 0))

    def k_spec(width):   # neighbor-tile inputs: double-buffered along j
        return pl.BlockSpec((1, tk, width), lambda b, i, j: (b, j, 0))

    def w_spec(shape):   # weights: grid-constant index map -> no re-DMA
        return pl.BlockSpec(shape, lambda b, i, j: (0,) * len(shape))

    kernel = functools.partial(_point_transformer_kernel, mxu_dtype=mxu_dtype)

    return pl.pallas_call(
        kernel,
        out_shape=jax.ShapeDtypeStruct((B, N, D), x.dtype),
        grid_spec=pltpu.PrefetchScalarGridSpec(
            num_scalar_prefetch=0,
            grid=grid,
            in_specs=[
                q_spec(E),            # qa
                q_spec(H),            # p1q
                k_spec(E),            # ka
                k_spec(H),            # p1k
                k_spec(D),            # vb
                w_spec((H, D + E)),   # [pw2 | pw2 @ aw1]
                w_spec((E, D)),       # aw2
            ],
            out_specs=pl.BlockSpec((1, tq, D), lambda b, i, j: (b, i, 0)),
            scratch_shapes=[pltpu.VMEM((tq, D), jnp.float32)] * 3,  # m, l, acc
        ),
        compiler_params=pltpu.CompilerParams(
            dimension_semantics=("parallel", "parallel", "arbitrary"),
            vmem_limit_bytes=_vmem_limit_bytes(),
        ),
    )(qa, p1q, ka, p1k, vb, w_cat, aw2)


def reference_forward(x, pos, params):
    """Pure-JAX reference matching the PyTorch forward (mask/nneighbors None)."""
    (wq, wk, wv, pw1, pb1, pw2, pb2, aw1, ab1, aw2, ab2) = params
    q = x @ wq
    k = x @ wk
    v = x @ wv
    qk_rel = q[:, :, None, :] - k[:, None, :, :]
    rel_pos = pos[:, :, None, :] - pos[:, None, :, :]
    h = jnp.maximum(rel_pos @ pw1 + pb1[0], 0.0)
    rel_pos_emb = h @ pw2 + pb2[0]
    v_full = v[:, None, :, :] + rel_pos_emb
    ah = jnp.maximum((qk_rel + rel_pos_emb) @ aw1 + ab1[0], 0.0)
    sim = ah @ aw2 + ab2[0]
    attn = jax.nn.softmax(sim, axis=-2)
    return jnp.einsum("bijd,bijd->bid", attn, v_full)


if __name__ == "__main__":
    B, N, D = 2, 32, 32
    EMB_HIDDEN = 16
    ATTN_EXPANSION = 2
    E = D * ATTN_EXPANSION

    key = jax.random.PRNGKey(0)
    keys = jax.random.split(key, 16)

    x = jax.random.normal(keys[0], (B, N, D), dtype=jnp.float32)
    pos = jax.random.normal(keys[1], (B, N, 3), dtype=jnp.float32)

    def init_w(k, shape, fan_in):
        return (jax.random.uniform(k, shape, jnp.float32, -1.0, 1.0)
                / jnp.sqrt(jnp.float32(fan_in)))

    # Weights stored as (in, out) == transpose of PyTorch nn.Linear weight.
    wq = init_w(keys[2], (D, D), D)
    wk = init_w(keys[3], (D, D), D)
    wv = init_w(keys[4], (D, D), D)
    pw1 = init_w(keys[5], (3, EMB_HIDDEN), 3)
    pb1 = init_w(keys[6], (1, EMB_HIDDEN), 3)
    pw2 = init_w(keys[7], (EMB_HIDDEN, D), EMB_HIDDEN)
    pb2 = init_w(keys[8], (1, D), EMB_HIDDEN)
    aw1 = init_w(keys[9], (D, E), D)
    ab1 = init_w(keys[10], (1, E), D)
    aw2 = init_w(keys[11], (E, D), E)
    ab2 = init_w(keys[12], (1, D), E)

    params = (wq, wk, wv, pw1, pb1, pw2, pb2, aw1, ab1, aw2, ab2)

    ref = reference_forward(x, pos, params)

    # Multi-tile path: grid = (B, N/16, N/16) = (2, 2, 2); exercises the online
    # softmax accumulation over neighbor tiles.
    out_tiled = jax.block_until_ready(
        point_transformer_layer(x, pos, params, tq=16, tk=16))
    # Default tiling (tq = tk = min(N, 128) = N here): single neighbor tile.
    out_full = jax.block_until_ready(point_transformer_layer(x, pos, params))
    # bf16 MXU operands (production setting on v5e/v6e/v7x); f32 accumulation
    # and softmax stats, so accuracy degrades only mildly.
    out_bf16 = jax.block_until_ready(
        point_transformer_layer(x, pos, params, tq=16, tk=16,
                                mxu_dtype=jnp.bfloat16))

    assert out_tiled.shape == (B, N, D)
    assert jnp.allclose(out_tiled, ref, atol=2e-3, rtol=2e-3), \
        "tiled mismatch vs reference"
    assert jnp.allclose(out_full, ref, atol=2e-3, rtol=2e-3), \
        "full-tile mismatch vs reference"
    assert jnp.allclose(out_bf16, ref, atol=1e-1, rtol=1e-1), \
        "bf16-MXU mismatch vs reference"

    print("KERNEL_OK")
</pallas_src>

<mosaic_0001>
module attributes {stable_mosaic.version = 11 : i64} {
  func.func @_point_transformer_kernel(%arg0: i32, %arg1: i32, %arg2: i32, %arg3: memref<1x16x64xf32, #tpu.memory_space<vmem>>, %arg4: memref<1x16x16xf32, #tpu.memory_space<vmem>>, %arg5: memref<1x16x64xf32, #tpu.memory_space<vmem>>, %arg6: memref<1x16x16xf32, #tpu.memory_space<vmem>>, %arg7: memref<1x16x32xf32, #tpu.memory_space<vmem>>, %arg8: memref<16x96xf32, #tpu.memory_space<vmem>>, %arg9: memref<64x32xf32, #tpu.memory_space<vmem>>, %arg10: memref<1x16x32xf32, #tpu.memory_space<vmem>>, %arg11: memref<16x32xf32, #tpu.memory_space<vmem>>, %arg12: memref<16x32xf32, #tpu.memory_space<vmem>>, %arg13: memref<16x32xf32, #tpu.memory_space<vmem>>) attributes {dimension_semantics = [#tpu.dimension_semantics<parallel>, #tpu.dimension_semantics<parallel>, #tpu.dimension_semantics<arbitrary>], iteration_bounds = array<i64: 2, 2, 2>, scalar_prefetch = 0 : i64, scratch_operands = 3 : i64, tpu.core_type = #tpu.core_type<tc>, window_params = [{transform_indices = @transform_0, window_bounds = array<i64: 1, 16, 64>}, {transform_indices = @transform_1, window_bounds = array<i64: 1, 16, 16>}, {transform_indices = @transform_2, window_bounds = array<i64: 1, 16, 64>}, {transform_indices = @transform_3, window_bounds = array<i64: 1, 16, 16>}, {transform_indices = @transform_4, window_bounds = array<i64: 1, 16, 32>}, {pipeline_mode = #tpu.pipeline_mode<synchronous>, transform_indices = @transform_5, window_bounds = array<i64: 16, 96>}, {pipeline_mode = #tpu.pipeline_mode<synchronous>, transform_indices = @transform_6, window_bounds = array<i64: 64, 32>}, {transform_indices = @transform_7, window_bounds = array<i64: 1, 16, 32>}]} {
    %c0_i32 = arith.constant 0 : i32
    %0 = arith.cmpi eq, %arg2, %c0_i32 : i32
    %1 = arith.extui %0 : i1 to i32
    %c0_i32_0 = arith.constant 0 : i32
    %2 = arith.cmpi ne, %1, %c0_i32_0 : i32
    scf.if %2 {
      %cst_38 = arith.constant 0xFF800000 : f32
      %66 = vector.broadcast %cst_38 : f32 to vector<16x32xf32>
      %c0_39 = arith.constant 0 : index
      %c0_40 = arith.constant 0 : index
      %67 = vector.load %arg11[%c0_39, %c0_40] : memref<16x32xf32, #tpu.memory_space<vmem>>, vector<16x32xf32>
      tpu.vector_store %arg11[%c0_39, %c0_40], %66 {strides = array<i32>} : memref<16x32xf32, #tpu.memory_space<vmem>>, vector<16x32xf32>,
      %cst_41 = arith.constant 0.000000e+00 : f32
      %68 = vector.broadcast %cst_41 : f32 to vector<16x32xf32>
      %c0_42 = arith.constant 0 : index
      %c0_43 = arith.constant 0 : index
      %69 = vector.load %arg12[%c0_42, %c0_43] : memref<16x32xf32, #tpu.memory_space<vmem>>, vector<16x32xf32>
      tpu.vector_store %arg12[%c0_42, %c0_43], %68 {strides = array<i32>} : memref<16x32xf32, #tpu.memory_space<vmem>>, vector<16x32xf32>,
      %cst_44 = arith.constant 0.000000e+00 : f32
      %70 = vector.broadcast %cst_44 : f32 to vector<16x32xf32>
      %c0_45 = arith.constant 0 : index
      %c0_46 = arith.constant 0 : index
      %71 = vector.load %arg13[%c0_45, %c0_46] : memref<16x32xf32, #tpu.memory_space<vmem>>, vector<16x32xf32>
      tpu.vector_store %arg13[%c0_45, %c0_46], %70 {strides = array<i32>} : memref<16x32xf32, #tpu.memory_space<vmem>>, vector<16x32xf32>,
    } else {
    }
    %c0 = arith.constant 0 : index
    %c0_1 = arith.constant 0 : index
    %c0_2 = arith.constant 0 : index
    %3 = vector.load %arg3[%c0, %c0_1, %c0_2] : memref<1x16x64xf32, #tpu.memory_space<vmem>>, vector<1x16x64xf32>
    %4 = vector.shape_cast %3 : vector<1x16x64xf32> to vector<16x64xf32>
    %c0_3 = arith.constant 0 : index
    %c0_4 = arith.constant 0 : index
    %c0_5 = arith.constant 0 : index
    %5 = vector.load %arg4[%c0_3, %c0_4, %c0_5] : memref<1x16x16xf32, #tpu.memory_space<vmem>>, vector<1x16x16xf32>
    %6 = vector.shape_cast %5 : vector<1x16x16xf32> to vector<16x16xf32>
    %c0_6 = arith.constant 0 : index
    %c0_7 = arith.constant 0 : index
    %c0_8 = arith.constant 0 : index
    %7 = vector.load %arg5[%c0_6, %c0_7, %c0_8] : memref<1x16x64xf32, #tpu.memory_space<vmem>>, vector<1x16x64xf32>
    %8 = vector.shape_cast %7 : vector<1x16x64xf32> to vector<16x64xf32>
    %c0_9 = arith.constant 0 : index
    %c0_10 = arith.constant 0 : index
    %c0_11 = arith.constant 0 : index
    %9 = vector.load %arg6[%c0_9, %c0_10, %c0_11] : memref<1x16x16xf32, #tpu.memory_space<vmem>>, vector<1x16x16xf32>
    %10 = vector.shape_cast %9 : vector<1x16x16xf32> to vector<16x16xf32>
    %c0_12 = arith.constant 0 : index
    %c0_13 = arith.constant 0 : index
    %c0_14 = arith.constant 0 : index
    %11 = vector.load %arg7[%c0_12, %c0_13, %c0_14] : memref<1x16x32xf32, #tpu.memory_space<vmem>>, vector<1x16x32xf32>
    %12 = vector.shape_cast %11 : vector<1x16x32xf32> to vector<16x32xf32>
    %13 = vector.shape_cast %6 : vector<16x16xf32> to vector<16x1x16xf32>
    %14 = vector.shape_cast %10 : vector<16x16xf32> to vector<1x16x16xf32>
    %15 = vector.broadcast %13 : vector<16x1x16xf32> to vector<16x16x16xf32>
    %16 = vector.broadcast %14 : vector<1x16x16xf32> to vector<16x16x16xf32>
    %17 = arith.subf %15, %16 : vector<16x16x16xf32>
    %cst = arith.constant 0.000000e+00 : f32
    %18 = vector.broadcast %cst : f32 to vector<16x16x16xf32>
    %19 = arith.maximumf %17, %18 : vector<16x16x16xf32>
    %20 = vector.shape_cast %19 : vector<16x16x16xf32> to vector<256x16xf32>
    %c0_15 = arith.constant 0 : index
    %c0_16 = arith.constant 0 : index
    %21 = vector.load %arg8[%c0_15, %c0_16] : memref<16x96xf32, #tpu.memory_space<vmem>>, vector<16x96xf32>
    %cst_17 = arith.constant dense<0.000000e+00> : vector<256x96xf32>
    %22 = tpu.matmul %20, %21, %cst_17 {dimension_numbers = #tpu.dot_dimension_numbers<[1], [0], [0], [1], [0, 0, 1, 1], [], []>} : vector<256x16xf32>, vector<16x96xf32>, vector<256x96xf32> -> vector<256x96xf32>
    %23 = vector.extract_strided_slice %22 {offsets = [0, 0], sizes = [256, 32], strides = [1, 1]} : vector<256x96xf32> to vector<256x32xf32>
    %24 = vector.shape_cast %23 : vector<256x32xf32> to vector<16x16x32xf32>
    %25 = vector.extract_strided_slice %22 {offsets = [0, 32], sizes = [256, 64], strides = [1, 1]} : vector<256x96xf32> to vector<256x64xf32>
    %26 = vector.shape_cast %25 : vector<256x64xf32> to vector<16x16x64xf32>
    %27 = vector.shape_cast %12 : vector<16x32xf32> to vector<1x16x32xf32>
    %28 = vector.broadcast %27 : vector<1x16x32xf32> to vector<16x16x32xf32>
    %29 = arith.addf %28, %24 : vector<16x16x32xf32>
    %30 = vector.shape_cast %4 : vector<16x64xf32> to vector<16x1x64xf32>
    %31 = vector.shape_cast %8 : vector<16x64xf32> to vector<1x16x64xf32>
    %32 = vector.broadcast %30 : vector<16x1x64xf32> to vector<16x16x64xf32>
    %33 = vector.broadcast %31 : vector<1x16x64xf32> to vector<16x16x64xf32>
    %34 = arith.subf %32, %33 : vector<16x16x64xf32>
    %35 = arith.addf %34, %26 : vector<16x16x64xf32>
    %cst_18 = arith.constant 0.000000e+00 : f32
    %36 = vector.broadcast %cst_18 : f32 to vector<16x16x64xf32>
    %37 = arith.maximumf %35, %36 : vector<16x16x64xf32>
    %38 = vector.shape_cast %37 : vector<16x16x64xf32> to vector<256x64xf32>
    %c0_19 = arith.constant 0 : index
    %c0_20 = arith.constant 0 : index
    %39 = vector.load %arg9[%c0_19, %c0_20] : memref<64x32xf32, #tpu.memory_space<vmem>>, vector<64x32xf32>
    %cst_21 = arith.constant dense<0.000000e+00> : vector<256x32xf32>
    %40 = tpu.matmul %38, %39, %cst_21 {dimension_numbers = #tpu.dot_dimension_numbers<[1], [0], [0], [1], [0, 0, 1, 1], [], []>} : vector<256x64xf32>, vector<64x32xf32>, vector<256x32xf32> -> vector<256x32xf32>
    %41 = vector.shape_cast %40 : vector<256x32xf32> to vector<16x16x32xf32>
    %c0_22 = arith.constant 0 : index
    %c0_23 = arith.constant 0 : index
    %42 = vector.load %arg11[%c0_22, %c0_23] : memref<16x32xf32, #tpu.memory_space<vmem>>, vector<16x32xf32>
    %cst_24 = arith.constant dense<0xFF800000> : vector<16x32xf32>
    %43 = vector.multi_reduction <maximumf>, %41, %cst_24 [1] : vector<16x16x32xf32> to vector<16x32xf32>
    %44 = arith.maximumf %42, %43 : vector<16x32xf32>
    %45 = arith.subf %42, %44 : vector<16x32xf32>
    %46 = math.exp %45 : vector<16x32xf32>
    %47 = vector.shape_cast %44 : vector<16x32xf32> to vector<16x1x32xf32>
    %48 = vector.broadcast %47 : vector<16x1x32xf32> to vector<16x16x32xf32>
    %49 = arith.subf %41, %48 : vector<16x16x32xf32>
    %50 = math.exp %49 : vector<16x16x32xf32>
    %c0_25 = arith.constant 0 : index
    %c0_26 = arith.constant 0 : index
    %51 = vector.load %arg12[%c0_25, %c0_26] : memref<16x32xf32, #tpu.memory_space<vmem>>, vector<16x32xf32>
    %52 = arith.mulf %46, %51 : vector<16x32xf32>
    %cst_27 = arith.constant dense<0.000000e+00> : vector<16x32xf32>
    %53 = vector.multi_reduction <add>, %50, %cst_27 [1] : vector<16x16x32xf32> to vector<16x32xf32>
    %54 = arith.addf %52, %53 : vector<16x32xf32>
    %c0_28 = arith.constant 0 : index
    %c0_29 = arith.constant 0 : index
    %55 = vector.load %arg12[%c0_28, %c0_29] : memref<16x32xf32, #tpu.memory_space<vmem>>, vector<16x32xf32>
    tpu.vector_store %arg12[%c0_28, %c0_29], %54 {strides = array<i32>} : memref<16x32xf32, #tpu.memory_space<vmem>>, vector<16x32xf32>,
    %c0_30 = arith.constant 0 : index
    %c0_31 = arith.constant 0 : index
    %56 = vector.load %arg13[%c0_30, %c0_31] : memref<16x32xf32, #tpu.memory_space<vmem>>, vector<16x32xf32>
    %57 = arith.mulf %46, %56 : vector<16x32xf32>
    %58 = arith.mulf %50, %29 : vector<16x16x32xf32>
    %cst_32 = arith.constant dense<0.000000e+00> : vector<16x32xf32>
    %59 = vector.multi_reduction <add>, %58, %cst_32 [1] : vector<16x16x32xf32> to vector<16x32xf32>
    %60 = arith.addf %57, %59 : vector<16x32xf32>
    %c0_33 = arith.constant 0 : index
    %c0_34 = arith.constant 0 : index
    %61 = vector.load %arg13[%c0_33, %c0_34] : memref<16x32xf32, #tpu.memory_space<vmem>>, vector<16x32xf32>
    tpu.vector_store %arg13[%c0_33, %c0_34], %60 {strides = array<i32>} : memref<16x32xf32, #tpu.memory_space<vmem>>, vector<16x32xf32>,
    %c0_35 = arith.constant 0 : index
    %c0_36 = arith.constant 0 : index
    %62 = vector.load %arg11[%c0_35, %c0_36] : memref<16x32xf32, #tpu.memory_space<vmem>>, vector<16x32xf32>
    tpu.vector_store %arg11[%c0_35, %c0_36], %44 {strides = array<i32>} : memref<16x32xf32, #tpu.memory_space<vmem>>, vector<16x32xf32>,
    %c1_i32 = arith.constant 1 : i32
    %63 = arith.cmpi eq, %arg2, %c1_i32 : i32
    %64 = arith.extui %63 : i1 to i32
    %c0_i32_37 = arith.constant 0 : i32
    %65 = arith.cmpi ne, %64, %c0_i32_37 : i32
    scf.if %65 {
      %c0_38 = arith.constant 0 : index
      %c0_39 = arith.constant 0 : index
      %66 = vector.load %arg12[%c0_38, %c0_39] : memref<16x32xf32, #tpu.memory_space<vmem>>, vector<16x32xf32>
      %67 = tpu.reciprocal %66 {approx = true} : vector<16x32xf32> -> vector<16x32xf32>
      %c0_40 = arith.constant 0 : index
      %c0_41 = arith.constant 0 : index
      %68 = vector.load %arg13[%c0_40, %c0_41] : memref<16x32xf32, #tpu.memory_space<vmem>>, vector<16x32xf32>
      %69 = arith.mulf %68, %67 : vector<16x32xf32>
      %c0_42 = arith.constant 0 : index
      %c0_43 = arith.constant 0 : index
      %c0_44 = arith.constant 0 : index
      %70 = vector.load %arg10[%c0_42, %c0_43, %c0_44] : memref<1x16x32xf32, #tpu.memory_space<vmem>>, vector<1x16x32xf32>
      %71 = vector.shape_cast %70 : vector<1x16x32xf32> to vector<16x32xf32>
      %72 = vector.shape_cast %69 : vector<16x32xf32> to vector<1x16x32xf32>
      tpu.vector_store %arg10[%c0_42, %c0_43, %c0_44], %72 {strides = array<i32>} : memref<1x16x32xf32, #tpu.memory_space<vmem>>, vector<1x16x32xf32>,
    } else {
    }
    return
  }
  func.func @transform_0(%arg0: i32, %arg1: i32, %arg2: i32) -> (i32, i32, i32) {
    %c0_i32 = arith.constant 0 : i32
    %c0_i32_0 = arith.constant 0 : i32
    return %arg0, %arg1, %c0_i32 : i32, i32, i32
  }
  func.func @transform_1(%arg0: i32, %arg1: i32, %arg2: i32) -> (i32, i32, i32) {
    %c0_i32 = arith.constant 0 : i32
    %c0_i32_0 = arith.constant 0 : i32
    return %arg0, %arg1, %c0_i32 : i32, i32, i32
  }
  func.func @transform_2(%arg0: i32, %arg1: i32, %arg2: i32) -> (i32, i32, i32) {
    %c0_i32 = arith.constant 0 : i32
    %c0_i32_0 = arith.constant 0 : i32
    return %arg0, %arg2, %c0_i32 : i32, i32, i32
  }
  func.func @transform_3(%arg0: i32, %arg1: i32, %arg2: i32) -> (i32, i32, i32) {
    %c0_i32 = arith.constant 0 : i32
    %c0_i32_0 = arith.constant 0 : i32
    return %arg0, %arg2, %c0_i32 : i32, i32, i32
  }
  func.func @transform_4(%arg0: i32, %arg1: i32, %arg2: i32) -> (i32, i32, i32) {
    %c0_i32 = arith.constant 0 : i32
    %c0_i32_0 = arith.constant 0 : i32
    return %arg0, %arg2, %c0_i32 : i32, i32, i32
  }
  func.func @transform_5(%arg0: i32, %arg1: i32, %arg2: i32) -> (i32, i32) {
    %c0_i32 = arith.constant 0 : i32
    %c0_i32_0 = arith.constant 0 : i32
    %c0_i32_1 = arith.constant 0 : i32
    return %c0_i32, %c0_i32_0 : i32, i32
  }
  func.func @transform_6(%arg0: i32, %arg1: i32, %arg2: i32) -> (i32, i32) {
    %c0_i32 = arith.constant 0 : i32
    %c0_i32_0 = arith.constant 0 : i32
    %c0_i32_1 = arith.constant 0 : i32
    return %c0_i32, %c0_i32_0 : i32, i32
  }
  func.func @transform_7(%arg0: i32, %arg1: i32, %arg2: i32) -> (i32, i32, i32) {
    %c0_i32 = arith.constant 0 : i32
    %c0_i32_0 = arith.constant 0 : i32
    return %arg0, %arg1, %c0_i32 : i32, i32, i32
  }
}

</mosaic_0001>

<bundles_post_ra>
// kernel: tpu_custom_call.1
= control target key start
LH: loop header
LB: loop body
LE: loop exit
PB: predicated region body
PF: predicated region fallthrough
CT: control target
= control target key end

     0   :  { %s5408_s0 = inlined_call_operand.hbm [shape: f32[2,32,64], index: 0, kind: input, shape index: {}]   ;;  %s5409_s1 = inlined_call_operand.hbm [shape: f32[2,32,16], index: 1, kind: input, shape index: {}]   ;;  %s5410_s2 = inlined_call_operand.hbm [shape: f32[2,32,64], index: 2, kind: input, shape index: {}]   ;;  %s5411_s3 = inlined_call_operand.hbm [shape: f32[2,32,16], index: 3, kind: input, shape index: {}]   ;;  %s5412_s4 = inlined_call_operand.hbm [shape: f32[2,32,32], index: 4, kind: input, shape index: {}]   ;;  %s5413_s5 = inlined_call_operand.hbm [shape: f32[16,96], index: 5, kind: input, shape index: {}]   ;;  %s5414_s6 = inlined_call_operand.hbm [shape: f32[64,32], index: 6, kind: input, shape index: {}]   ;;  %s5415_s7 = inlined_call_operand.hbm [shape: f32[2,32,32], index: 7, kind: output, shape index: {}]  }
   0x1   :  { %5476 = sst [smem:[#allocation71_spill]] %s5409_s1 }
   0x2   :  { %5477 = sst [smem:[#allocation72_spill]] %s5411_s3 }
   0x3   :  { %5478 = sst [smem:[#allocation73_spill]] %s5412_s4 }
   0x4   :  { %5479 = sst [smem:[#allocation74_spill]] %s5413_s5 }
   0x5   :  { %5480 = sst [smem:[#allocation75_spill]] %s5415_s7 }
   0x6   :  { %12 = vsyncpa [#allocation6], 0 }
   0x7   :  { %14 = vsyncpa [#allocation6 + $0x1], 0 }
   0x8   :  { %15 = vsyncpa [#allocation9], 0 }
   0x9   :  { %17 = vsyncpa [#allocation9 + $0x1], 0 }
   0xa   :  { %18 = vsyncpa [#allocation12], 0 }
   0xb   :  { %20 = vsyncpa [#allocation12 + $0x1], 0 }
   0xc   :  { %21 = vsyncpa [#allocation15], 0 }
   0xd   :  { %22 = vsyncpa [#allocation7], 0 }
   0xe   :  { %24 = vsyncpa [#allocation7 + $0x1], 0  ;;  %s3983_s24 = smov 0   ;;  %s3985_s25 = smov 0  }
   0xf   :  { %s3987_s26 = smov 0   ;;  %s3989_s27 = smov 0  }
  0x10   :  { %s3991_s28 = smov 0   ;;  %s3993_s29 = smov 0  }
  0x11   :  { %s3995_s30 = smov 0   ;;  %s3997_s8 = smov 0  }
  0x12   :  { %s3999_s9 = smov 0   ;;  %s4001_s10 = smov 0  }
  0x13   :  { %s4003_s11 = smov 0   ;;  %s4005_s12 = smov 0  }
  0x14   :  { %s4007_s13 = smov 0  }
  0x15 LB: > { %5481 = sst [smem:[#allocation24_spill]] %s3881_s25  ;;  %s4047_s14 = sadd.s32 4294967295, %s3925_s13   ;;  %s3925_s13 = sphi %s4007_s13, %s30_s13   ;;  %s3921_s12 = sphi %s4005_s12, %s5633_s12   ;;  %s3917_s11 = sphi %s4003_s11, %s5624_s11   ;;  %s3913_s10 = sphi %s4001_s10, %s5632_s10   ;;  %s3909_s9 = sphi %s3999_s9, %s5622_s9   ;;  %s3905_s8 = sphi %s3997_s8, %s5631_s8   ;;  %s3901_s30 = sphi %s3995_s30, %s5620_s30   ;;  %s3897_s29 = sphi %s3993_s29, %s5630_s29   ;;  %s3893_s28 = sphi %s3991_s28, %s5629_s28   ;;  %s3889_s27 = sphi %s3989_s27, %s5619_s27   ;;  %s3885_s26 = sphi %s3987_s26, %s5628_s26   ;;  %s3881_s25 = sphi %s3985_s25, %s5627_s25   ;;  %s3877_s24 = sphi %s3983_s24, %s5618_s24  }
  0x16   : > { %5482 = sst [smem:[#allocation25_spill]] %s3889_s27  ;;  %s2998_s15 = sadd.s32 4294967294, %s3925_s13  }
  0x17   : > { %5483 = sst [smem:[#allocation26_spill]] %s3893_s28  ;;  %p71_p0 = scmp.ne.s32.totalorder %s3893_s28, %s3889_s27 }
  0x18   : > { %5484 = sst [smem:[#allocation27_spill]] %s3901_s30  ;;  %p5419_p1 = scmp.eq.s32.totalorder %s4047_s14, 0 }
  0x19   : > { %5485 = sst [smem:[#allocation28_spill]] %s3905_s8  ;;  %p127_p2 = scmp.ne.s32.totalorder %s3881_s25, %s3877_s24 }
  0x1a   : > { %5486 = sst [smem:[#allocation29_spill]] %s3909_s9  ;;  %p4057_p4 = por %p5419_p1, %p71_p0 }
  0x1b   : > { %5487 = sst [smem:[#allocation30_spill]] %s3913_s10  ;;  %p257_p5 = scmp.eq.s32.totalorder %s2998_s15, 7 }
  0x1c   : > { %5488 = sst [smem:[#allocation31_spill]] %s3917_s11  ;;  %p4063_p6 = por %p127_p2, %p5419_p1 }
  0x1d   : > { %5489 = sst [smem:[#allocation32_spill]] %s3921_s12  ;;  %p2999_p7 = scmp.ge.s32.totalorder %s3925_s13, 1 }
  0x1e   : > { %5490 = sst [smem:[#allocation33_spill]] %s3925_s13  ;;  %p4068_p8 = por %p257_p5, %p71_p0 }
  0x1f   : > { %5491 = sst [smem:[#allocation34_spill]] %s4047_s14  ;;  %p264_p9 = scmp.lt.s32.totalorder %s3925_s13, 9 }
  0x20   : > { %s5492_s16 = scalar_select %p4057_p4, 1, 0 }
  0x21   : > { %s5494_s17 = scalar_select %p4063_p6, 1, 0 }
  0x22   : > { %5493 = sst [smem:[#allocation35_spill]] %s5492_s16  ;;  %p4073_p10 = pnand %p2999_p7, %p264_p9 }
  0x23   : > { %5495 = sst [smem:[#allocation36_spill]] %s5494_s17  ;;  %s3927_s20 = smov [#allocation14]  }
  0x24   : > { %s5496_s18 = scalar_select %p4068_p8, 1, 0 }
  0x25   : > { %s5498_s19 = scalar_select %p4073_p10, 1, 0 }
  0x26   : > { %5497 = sst [smem:[#allocation37_spill]] %s5496_s18  ;;  %s276_s21 = sshll.u32 %s3927_s20, 4  ;;  %s277_s21 = int_to_ptr.vmem [resolvable:$true] %s276_s21 }
  0x27   : > { %5499 = sst [smem:[#allocation38_spill]] %s5498_s19  ;;  %p3342_p11 = pneg %p4073_p10 }
  0x28   : > { %s5501_s5 = sld [smem:[#allocation74_spill]] }
  0x29   : > { %p4081_p12 = pnand %p3342_p11, %p5419_p1 }
  0x2b   : > { %s5500_s22 = scalar_select %p4081_p12, 1, 0 }
  0x2c   : > { %p5436_p0 = pneg %p4081_p12 }
  0x2e   : > { %s3565_s15 = scalar_lea.hbm %s5501_s5, 256 }
  0x2f   : > { %p3566_p13 = scmp.ne.s32.totalorder %s5501_s5, %s3565_s15  ;;  %p3572_p7 = scmp.lt.u32.totalorder %s3565_s15, %s5501_s5 }
  0x31   : > { %p3568_p2 = pnand %p5436_p0, %p3566_p13 }
  0x33   : > { %p3569_p5 = pneg %p3568_p2 }
  0x35   : > { %p3574_p9 = pnand %p3572_p7, %p3569_p5 }
  0x37   : > { %3577 = shalt.err (!%p3574_p9)
}
  0x38   : > { %s3578_s23 = scalar_lea.vmem %s277_s21, 256  ;;  %p3586_p8 = scmp.lt.s32.totalorder %s277_s21, %s277_s21 }
  0x39   : > { %p3579_p11 = scmp.ne.s32.totalorder %s277_s21, %s3578_s23  ;;  %p3587_p6 = scmp.lt.s32.totalorder %s3578_s23, %s3578_s23 }
  0x3b   : > { %p3581_p1 = pnand %p3579_p11, %p5436_p0  ;;  %p3588_p4 = por %p3587_p6, %p3586_p8 }
  0x3d   : > { %p3582_p3 = pneg %p3581_p1 }
  0x3f   : > { %p3589_p10 = pnand %p3588_p4, %p3582_p3 }
  0x41   : > { %3592 = shalt.err (!%p3589_p10)
}
  0x42   : > { %s5424_s27 = smov 128   ;;  %s5426_s7 = smov 8  }
  0x43   : > { %3345 = dma.hbm_to_vmem [thread:$0]  (!%p4081_p12), %s5501_s5, 256, %s277_s21, [#allocation15], %s5424_s27, %s5424_s27, %s5426_s7  }
  0x44   : > { %p65_p1 = scmp.ne.s32.totalorder %s3897_s29, %s3893_s28  ;;  %p5438_p3 = scmp.eq.s32.totalorder %s3925_s13, 0 }
  0x45   : > { %p5437_p4 = scmp.lt.s32.totalorder %s3925_s13, 8  ;;  %s5423_s9 = sand.u32 1, %s3897_s29  }
  0x46   : > { %p67_p6 = por %p5438_p3, %p65_p1  ;;  %p5502_p8 = scmp.eq.s32.totalorder %s4047_s14, 7 }
  0x47   : > { %s4128_s30 = sshll.u32 %s5423_s9, 4  ;;  %s3004_s21 = sshll.u32 %s3917_s11, 1 }
  0x48   : > { %p4122_p10 = por %p5502_p8, %p65_p1  ;;  %s5430_s18 = sshll.u32 %s3921_s12, 2 }
  0x49   : > { %p4134_p13 = pnand %p5437_p4, %p67_p6  ;;  %s4140_s23 = sadd.s32 %s5430_s18, %s3004_s21 }
  0x4a   : > { %s5503_s8 = scalar_select %p4122_p10, 1, 0 }
  0x4b   : > { %s5505_s24 = scalar_select %p4134_p13, 1, 0 }
  0x4c   : > { %5504 = sst [smem:[#allocation39_spill]] %s5503_s8  ;;  %s5440_s20 = sand.u32 1, %s3925_s13  }
  0x4d   : > { %s5431_s15 = sshll.u32 %s4140_s23, 7  ;;  %s5506_s1 = sld [smem:[#allocation71_spill]] }
  0x4e   : > { %s330_s5 = scalar_lea.vmem [#allocation8], %s4128_s30  ;;  %s4156_s21 = scalar_lea.sflag [#allocation9], %s5440_s20 }
  0x4f   : > { %s339_s8 = sshll.u32 %s330_s5, 4  ;;  %5507 = sst [smem:[#allocation40_spill]] %s4156_s21  ;;  %s4152_s8 = int_to_ptr.vmem [resolvable:$true] %s339_s8 }
  0x50   : > { %p5452_p5 = pneg %p4134_p13 }
  0x53   : > { %s4149_s7 = scalar_lea.hbm %s5506_s1, %s5431_s15  ;;  %s3598_s15 = scalar_lea.hbm %s5506_s1, 1024 }
  0x54   : > { %s3593_s18 = scalar_lea.hbm %s4149_s7, 256  ;;  %p3599_p11 = scmp.lt.u32.totalorder %s4149_s7, %s5506_s1 }
  0x55   : > { %p3594_p2 = scmp.ne.s32.totalorder %s4149_s7, %s3593_s18  ;;  %p3600_p1 = scmp.lt.u32.totalorder %s3598_s15, %s3593_s18 }
  0x56   : > { %p3602_p8 = scmp.lt.u32.totalorder %s3593_s18, %s4149_s7 }
  0x57   : > { %p3596_p7 = pnand %p5452_p5, %p3594_p2  ;;  %p3601_p6 = por %p3600_p1, %p3599_p11 }
  0x59   : > { %p3597_p9 = pneg %p3596_p7  ;;  %p3603_p0 = por %p3602_p8, %p3601_p6 }
  0x5b   : > { %p3604_p4 = pnand %p3603_p0, %p3597_p9 }
  0x5d   : > { %3607 = shalt.err (!%p3604_p4)
}
  0x5e   : > { %s3608_s5 = scalar_lea.vmem %s4152_s8, 256  ;;  %s3930_s9 = smov [#allocation8]  }
  0x5f   : > { %p3609_p2 = scmp.ne.s32.totalorder %s4152_s8, %s3608_s5  ;;  %s3613_s27 = sshll.u32 %s3930_s9, 4  ;;  %s3614_s27 = int_to_ptr.vmem [resolvable:$false] %s3613_s27 }
  0x60   : > { %s3615_s14 = scalar_lea.vmem %s3614_s27, 512  ;;  %p3616_p10 = scmp.lt.s32.totalorder %s4152_s8, %s3614_s27 }
  0x61   : > { %p3611_p7 = pnand %p3609_p2, %p5452_p5  ;;  %p3617_p11 = scmp.lt.s32.totalorder %s3615_s14, %s3608_s5 }
  0x63   : > { %p3612_p3 = pneg %p3611_p7  ;;  %p3618_p1 = por %p3617_p11, %p3616_p10 }
  0x65   : > { %p3619_p6 = pnand %p3618_p1, %p3612_p3 }
  0x67   : > { %3622 = shalt.err (!%p3619_p6)
}
  0x68   : > { %s5508_s17 = smov 8   ;;  %s5509_s15 = smov 128  }
  0x69   : > { %3355 = dma.hbm_to_vmem [thread:$0]  (!%p4134_p13), %s4149_s7, 256, %s4152_s8, %s4156_s21, %s5509_s15, %s5509_s15, %s5508_s17  }
  0x6a   : > { %s42_s5 = sadd.s32 1, %s3913_s10  ;;  %p121_p0 = scmp.ne.s32.totalorder %s3885_s26, %s3881_s25 }
  0x6b   : > { %p43_p3 = scmp.ge.s32.totalorder %s42_s5, 2  ;;  %s351_s9 = sand.u32 1, %s3885_s26  }
  0x6c   : > { %p5510_p4 = scmp.eq.s32.totalorder %s3925_s13, 0  ;;  %s4194_s27 = sshll.u32 %s351_s9, 4 }
  0x6d   : > { %s5635_s5 = smov (%p43_p3, %s42_s5), 0  ;;  %s5512_s14 = sadd.s32 1, %s3917_s11 }
  0x6e   : > { %p123_p10 = por %p121_p0, %p5510_p4  ;;  %5511 = sst [smem:[#allocation41_spill]] %s5635_s5 }
  0x6f   : > { %s5637_s14 = smov (!%p43_p3, %s5512_s14), %s3917_s11  ;;  %s110_s8 = ssub.s32 %s3913_s10, %s5635_s5 }
  0x70   : > { %s3012_s7 = sshll.u32 %s3913_s10, 1  ;;  %p47_p9 = scmp.ge.s32.totalorder %s5637_s14, 2 }
  0x71   : > { %s5513_s18 = sshll.u32 %s3921_s12, 2  ;;  %p5514_p8 = scmp.lt.s32.totalorder %s3925_s13, 8 }
  0x72   : > { %s359_s20 = sadd.s32 %s3012_s7, %s5513_s18  ;;  %s5639_s14 = smov (%p47_p9, %s5637_s14), 0 }
  0x73   : > { %s4206_s1 = sshll.u32 %s359_s20, 7  ;;  %p4210_p2 = pnand %p5514_p8, %p123_p10 }
  0x74   : > { %5516 = sst [smem:[#allocation42_spill]] %s5639_s14  ;;  %s5517_s25 = sadd.s32 1, %s3921_s12 }
  0x75   : > { %s5515_s9 = scalar_select %p4210_p2, 1, 0 }
  0x76   : > { %s5641_s25 = smov (!%p47_p9, %s5517_s25), %s3921_s12  ;;  %s54_s5 = ssub.s32 %s3917_s11, %s5639_s14 }
  0x77   : > { %p51_p7 = scmp.ge.s32.totalorder %s5641_s25, 2  ;;  %s5518_s3 = sld [smem:[#allocation72_spill]] }
  0x78   : > { %s376_s18 = scalar_lea.vmem [#allocation11], %s4194_s27  ;;  %s5520_s10 = sand.u32 1, %s3925_s13  }
  0x79   : > { %s5643_s25 = smov (%p51_p7, %s5641_s25), 0  ;;  %s385_s7 = sshll.u32 %s376_s18, 4  ;;  %s4232_s7 = int_to_ptr.vmem [resolvable:$true] %s385_s7 }
  0x7a   : > { %5519 = sst [smem:[#allocation43_spill]] %s5643_s25  ;;  %s53_s28 = ssub.s32 %s3921_s12, %s5643_s25 }
  0x7b   : > { %s4234_s19 = sor.u32 %s54_s5, %s53_s28  ;;  %s4236_s14 = sor.u32 %s110_s8, %s53_s28 }
  0x7c   : > { %s4242_s16 = scalar_lea.sflag [#allocation12], %s5520_s10  ;;  %p4248_p0 = pneg %p4210_p2 }
  0x7d   : > { %s4225_s20 = scalar_lea.hbm %s5518_s3, %s4206_s1  ;;  %s3628_s8 = scalar_lea.hbm %s5518_s3, 1024 }
  0x7e   : > { %s3623_s11 = scalar_lea.hbm %s4225_s20, 256  ;;  %p3629_p10 = scmp.lt.u32.totalorder %s4225_s20, %s5518_s3 }
  0x7f   : > { %p3624_p6 = scmp.ne.s32.totalorder %s4225_s20, %s3623_s11  ;;  %p3630_p9 = scmp.lt.u32.totalorder %s3628_s8, %s3623_s11 }
  0x80   : > { %s5521_s18 = scalar_select %p4248_p0, 1, 0 }
  0x81   : > { %p3626_p3 = pnand %p4248_p0, %p3624_p6  ;;  %p3631_p8 = por %p3630_p9, %p3629_p10 }
  0x82   : > { %p3632_p7 = scmp.lt.u32.totalorder %s3623_s11, %s4225_s20 }
  0x83   : > { %p3627_p4 = pneg %p3626_p3 }
  0x84   : > { %p3633_p5 = por %p3632_p7, %p3631_p8 }
  0x86   : > { %p3634_p1 = pnand %p3633_p5, %p3627_p4 }
  0x88   : > { %3637 = shalt.err (!%p3634_p1)
}
  0x89   : > { %s3638_s10 = scalar_lea.vmem %s4232_s7, 256  ;;  %s3931_s5 = smov [#allocation11]  }
  0x8a   : > { %p3639_p6 = scmp.ne.s32.totalorder %s4232_s7, %s3638_s10  ;;  %s3643_s28 = sshll.u32 %s3931_s5, 4  ;;  %s3644_s28 = int_to_ptr.vmem [resolvable:$false] %s3643_s28 }
  0x8b   : > { %s3645_s25 = scalar_lea.vmem %s3644_s28, 512  ;;  %p3646_p13 = scmp.lt.s32.totalorder %s4232_s7, %s3644_s28 }
  0x8c   : > { %p3641_p3 = pnand %p3639_p6, %p4248_p0  ;;  %p3647_p12 = scmp.lt.s32.totalorder %s3645_s25, %s3638_s10 }
  0x8e   : > { %p3642_p11 = pneg %p3641_p3  ;;  %p3648_p10 = por %p3647_p12, %p3646_p13 }
  0x90   : > { %p3649_p9 = pnand %p3648_p10, %p3642_p11 }
  0x92   : > { %3652 = shalt.err (!%p3649_p9)
}
  0x93   : > { %3361 = dma.hbm_to_vmem [thread:$0]  (!%p4210_p2), %s4225_s20, 256, %s4232_s7, %s4242_s16, %s5509_s15, %s5509_s15, %s5508_s17  }
  0x94   : > { %s5522_s11 = sadd.s32 1, %s3897_s29  ;;  %p5523_p12 = scmp.eq.s32.totalorder %s4234_s19, 0 }
  0x95   : > { %s5524_s8 = sadd.s32 1, %s3885_s26  ;;  %p5525_p13 = scmp.eq.s32.totalorder %s4236_s14, 0 }
  0x96   : > { %s4280_s12 = scalar_select %p5523_p12, %s3897_s29, %s5522_s11  }
  0x97   : > { %s4287_s10 = scalar_select %p5525_p13, %s3885_s26, %s5524_s8  }
  0x98   : > { %s3932_s5 = smov [#allocation16]   ;;  %s3653_s13 = scalar_lea.hbm %s5414_s6, 1024 }
  0x99   : > { %s289_s28 = sshll.u32 %s3932_s5, 4  ;;  %p3654_p5 = scmp.ne.s32.totalorder %s5414_s6, %s3653_s13  ;;  %s290_s28 = int_to_ptr.vmem [resolvable:$true] %s289_s28 }
  0x9a   : > { %p5526_p11 = scmp.ne.s32.totalorder %s5500_s22, 0  ;;  %p3660_p7 = scmp.lt.u32.totalorder %s3653_s13, %s5414_s6 }
  0x9c   : > { %p5527_p1 = pneg %p5526_p11 }
  0x9e   : > { %p3656_p4 = pnand %p3654_p5, %p5527_p1 }
  0xa0   : > { %p3657_p8 = pneg %p3656_p4 }
  0xa2   : > { %p3662_p6 = pnand %p3660_p7, %p3657_p8 }
  0xa4   : > { %3665 = shalt.err (!%p3662_p6)
}
  0xa5   : > { %s3666_s14 = scalar_lea.vmem %s290_s28, 1024  ;;  %p5528_p10 = pmov %p5527_p1 }
  0xa6   : > { %p3667_p3 = scmp.ne.s32.totalorder %s290_s28, %s3666_s14  ;;  %p3674_p13 = scmp.lt.s32.totalorder %s290_s28, %s290_s28 }
  0xa7   : > { %p3675_p2 = scmp.lt.s32.totalorder %s3666_s14, %s3666_s14 }
  0xa8   : > { %p3669_p9 = pnand %p3667_p3, %p5528_p10 }
  0xa9   : > { %p3676_p0 = por %p3675_p2, %p3674_p13 }
  0xaa   : > { %p3670_p12 = pneg %p3669_p9 }
  0xac   : > { %p3677_p1 = pnand %p3676_p0, %p3670_p12 }
  0xae   : > { %3680 = shalt.err (!%p3677_p1)
}
  0xaf   : > { %3348 = dma.hbm_to_vmem [thread:$0]  (!%p5526_p11), %s5414_s6, 1024, %s290_s28, [#allocation15], %s5509_s15, %s5509_s15, %s5508_s17  }
  0xb0   : > { %s5529_s13 = sshll.u32 %s4140_s23, 7  ;;  %s307_s22 = scalar_lea.vmem [#allocation5], %s4128_s30 }
  0xb1   : > { %s4317_s11 = scalar_lea.hbm %s5408_s0, %s5529_s13  ;;  %s316_s8 = sshll.u32 %s307_s22, 4  ;;  %s4320_s8 = int_to_ptr.vmem [resolvable:$true] %s316_s8 }
  0xb2   : > { %s5530_s5 = sand.u32 1, %s3897_s29   ;;  %s3681_s19 = scalar_lea.hbm %s4317_s11, 256 }
  0xb3   : > { %s4324_s25 = scalar_lea.sflag [#allocation6], %s5530_s5  ;;  %p3682_p2 = scmp.ne.s32.totalorder %s4317_s11, %s3681_s19 }
  0xb4   : > { %p5531_p0 = scmp.ne.s32.totalorder %s5505_s24, 0  ;;  %s3686_s20 = scalar_lea.hbm %s5408_s0, 1024 }
  0xb5   : > { %p3687_p8 = scmp.lt.u32.totalorder %s4317_s11, %s5408_s0  ;;  %p3688_p7 = scmp.lt.u32.totalorder %s3686_s20, %s3681_s19 }
  0xb6   : > { %p5532_p5 = pneg %p5531_p0  ;;  %p3690_p3 = scmp.lt.u32.totalorder %s3681_s19, %s4317_s11 }
  0xb7   : > { %p3689_p6 = por %p3688_p7, %p3687_p8 }
  0xb8   : > { %p3684_p11 = pnand %p3682_p2, %p5532_p5 }
  0xb9   : > { %p3691_p10 = por %p3690_p3, %p3689_p6 }
  0xba   : > { %p3685_p4 = pneg %p3684_p11 }
  0xbc   : > { %p3692_p9 = pnand %p3691_p10, %p3685_p4 }
  0xbe   : > { %3695 = shalt.err (!%p3692_p9)
}
  0xbf   : > { %s3696_s30 = scalar_lea.vmem %s4320_s8, 256  ;;  %p5533_p13 = pmov %p5532_p5 }
  0xc0   : > { %p3697_p12 = scmp.ne.s32.totalorder %s4320_s8, %s3696_s30  ;;  %s3933_s4 = smov [#allocation5]  }
  0xc1   : > { %s3701_s13 = sshll.u32 %s3933_s4, 4  ;;  %s3702_s13 = int_to_ptr.vmem [resolvable:$false] %s3701_s13 }
  0xc2   : > { %p3699_p1 = pnand %p3697_p12, %p5533_p13  ;;  %s3703_s21 = scalar_lea.vmem %s3702_s13, 512 }
  0xc3   : > { %p3704_p5 = scmp.lt.s32.totalorder %s4320_s8, %s3702_s13  ;;  %p3705_p11 = scmp.lt.s32.totalorder %s3703_s21, %s3696_s30 }
  0xc4   : > { %p3700_p2 = pneg %p3699_p1 }
  0xc5   : > { %p3706_p8 = por %p3705_p11, %p3704_p5 }
  0xc7   : > { %p3707_p7 = pnand %p3706_p8, %p3700_p2 }
  0xc9   : > { %3710 = shalt.err (!%p3707_p7)
}
  0xca   : > { %3352 = dma.hbm_to_vmem [thread:$0]  (!%p5531_p0), %s4317_s11, 256, %s4320_s8, %s4324_s25, %s5509_s15, %s5509_s15, %s5508_s17  }
  0xcb   : > { %s4357_s5 = scalar_lea.hbm %s5410_s2, %s4206_s1  ;;  %s353_s24 = scalar_lea.vmem [#allocation10], %s4194_s27 }
  0xcc   : > { %s362_s19 = sshll.u32 %s353_s24, 4  ;;  %s3711_s23 = scalar_lea.hbm %s4357_s5, 256  ;;  %s4360_s19 = int_to_ptr.vmem [resolvable:$true] %s362_s19 }
  0xcd   : > { %p3712_p4 = scmp.ne.s32.totalorder %s4357_s5, %s3711_s23  ;;  %p5534_p6 = scmp.ne.s32.totalorder %s5521_s18, 0 }
  0xce   : > { %s3716_s8 = scalar_lea.hbm %s5410_s2, 1024  ;;  %p3717_p0 = scmp.lt.u32.totalorder %s4357_s5, %s5410_s2 }
  0xcf   : > { %p3714_p3 = pnand %p3712_p4, %p5534_p6  ;;  %p3718_p9 = scmp.lt.u32.totalorder %s3716_s8, %s3711_s23 }
  0xd0   : > { %p3720_p13 = scmp.lt.u32.totalorder %s3711_s23, %s4357_s5 }
  0xd1   : > { %p3715_p10 = pneg %p3714_p3  ;;  %p3719_p12 = por %p3718_p9, %p3717_p0 }
  0xd3   : > { %p3721_p1 = por %p3720_p13, %p3719_p12 }
  0xd5   : > { %p3722_p2 = pnand %p3721_p1, %p3715_p10 }
  0xd7   : > { %3725 = shalt.err (!%p3722_p2)
}
  0xd8   : > { %s3726_s14 = scalar_lea.vmem %s4360_s19, 256  ;;  %s3934_s3 = smov [#allocation10]  }
  0xd9   : > { %p3727_p5 = scmp.ne.s32.totalorder %s4360_s19, %s3726_s14  ;;  %s3731_s30 = sshll.u32 %s3934_s3, 4  ;;  %s3732_s30 = int_to_ptr.vmem [resolvable:$false] %s3731_s30 }
  0xda   : > { %s3733_s4 = scalar_lea.vmem %s3732_s30, 512  ;;  %p3734_p7 = scmp.lt.s32.totalorder %s4360_s19, %s3732_s30 }
  0xdb   : > { %p3729_p11 = pnand %p3727_p5, %p5534_p6  ;;  %p3735_p4 = scmp.lt.s32.totalorder %s3733_s4, %s3726_s14 }
  0xdd   : > { %p3730_p8 = pneg %p3729_p11  ;;  %p3736_p3 = por %p3735_p4, %p3734_p7 }
  0xdf   : > { %p3737_p0 = pnand %p3736_p3, %p3730_p8 }
  0xe1   : > { %3740 = shalt.err (!%p3737_p0)
}
  0xe2   : > { %p5535_p10 = scmp.ne.s32.totalorder %s5515_s9, 0  ;;  %s5536_s13 = sld [smem:[#allocation40_spill]] }
  0xe3   : > { %s5537_s22 = sld [smem:[#allocation73_spill]]  ;;  %s399_s23 = scalar_lea.vmem [#allocation13], %s4194_s27 }
  0xe4   : > { %s408_s28 = sshll.u32 %s399_s23, 4  ;;  %s4394_s28 = int_to_ptr.vmem [resolvable:$true] %s408_s28 }
  0xe8   : > { %3358 = dma.hbm_to_vmem [thread:$0]  (!%p5535_p10), %s4357_s5, 256, %s4360_s19, %s5536_s13, %s5509_s15, %s5509_s15, %s5508_s17  }
  0xe9   : > { %s4391_s24 = scalar_lea.hbm %s5537_s22, %s4206_s1  ;;  %s3746_s19 = scalar_lea.hbm %s5537_s22, 1024 }
  0xea   : > { %s3741_s11 = scalar_lea.hbm %s4391_s24, 256  ;;  %p3747_p1 = scmp.lt.u32.totalorder %s4391_s24, %s5537_s22 }
  0xeb   : > { %p3742_p9 = scmp.ne.s32.totalorder %s4391_s24, %s3741_s11  ;;  %p3748_p2 = scmp.lt.u32.totalorder %s3746_s19, %s3741_s11 }
  0xec   : > { %p3750_p11 = scmp.lt.u32.totalorder %s3741_s11, %s4391_s24 }
  0xed   : > { %p3744_p12 = pnand %p3742_p9, %p5534_p6  ;;  %p3749_p5 = por %p3748_p2, %p3747_p1 }
  0xef   : > { %p3745_p13 = pneg %p3744_p12  ;;  %p3751_p8 = por %p3750_p11, %p3749_p5 }
  0xf1   : > { %p3752_p7 = pnand %p3751_p8, %p3745_p13 }
  0xf3   : > { %3755 = shalt.err (!%p3752_p7)
}
  0xf4   : > { %s3756_s27 = scalar_lea.vmem %s4394_s28, 256  ;;  %s3935_s20 = smov [#allocation13]  }
  0xf5   : > { %p3757_p4 = scmp.ne.s32.totalorder %s4394_s28, %s3756_s27  ;;  %s3761_s14 = sshll.u32 %s3935_s20, 4  ;;  %s3762_s14 = int_to_ptr.vmem [resolvable:$false] %s3761_s14 }
  0xf6   : > { %s3763_s3 = scalar_lea.vmem %s3762_s14, 512  ;;  %p3764_p9 = scmp.lt.s32.totalorder %s4394_s28, %s3762_s14 }
  0xf7   : > { %p3759_p3 = pnand %p3757_p4, %p5534_p6  ;;  %p3765_p12 = scmp.lt.s32.totalorder %s3763_s3, %s3756_s27 }
  0xf9   : > { %p3760_p0 = pneg %p3759_p3  ;;  %p3766_p1 = por %p3765_p12, %p3764_p9 }
  0xfb   : > { %p3767_p2 = pnand %p3766_p1, %p3760_p0 }
  0xfd   : > { %3770 = shalt.err (!%p3767_p2)
}
  0xfe   : > { %3364 = dma.hbm_to_vmem [thread:$0]  (!%p5535_p10), %s4391_s24, 256, %s4394_s28, %s4242_s16, %s5509_s15, %s5509_s15, %s5508_s17  }
  0xff   : > { %s5538_s18 = sld [smem:[#allocation38_spill]] }
 0x105   : > { %p5539_p6 = scmp.ne.s32.totalorder %s5538_s18, 0 }
 0x107   : > { %420 = sbr.rel (%p5539_p6) target bundleno = 1140 (0x474), region = 48 }
 0x10e   : > { %s5540_s30 = sld [smem:[#allocation26_spill]]  ;;  %s5541_s4 = sld [smem:[#allocation35_spill]] }
 0x114   : > { %s4424_s13 = sand.u32 1, %s5540_s30   ;;  %p5542_p13 = scmp.ne.s32.totalorder %s5541_s4, 0 }
 0x115   : > { %s4427_s21 = sshll.u32 %s4424_s13, 4  ;;  %s423_s9 = scalar_lea.sflag [#allocation6], %s4424_s13 }
 0x116   : > { %s426_s7 = scalar_lea.vmem [#allocation5], %s4427_s21 }
 0x117   : > { %3852 = dma.done.wait (%p5542_p13), %s423_s9, 256  }
 0x118   : > { %3854 = vsyncadd (%p5542_p13), %s423_s9, 4294967040  ;;  %s5543_s17 = sld [smem:[#allocation34_spill]]  ;;  %s435_s24 = scalar_lea.vmem [#allocation8], %s4427_s21 }
 0x11e   : > { %s431_s15 = sand.u32 1, %s5543_s17  }
 0x11f   : > { %s432_s16 = scalar_lea.sflag [#allocation9], %s431_s15 }
 0x120   : > { %3856 = dma.done.wait (%p5542_p13), %s432_s16, 256  }
 0x121   : > { %3858 = vsyncadd (%p5542_p13), %s432_s16, 4294967040  ;;  %s5544_s23 = sld [smem:[#allocation24_spill]]  ;;  %s5545_s28 = sld [smem:[#allocation36_spill]] }
 0x127   : > { %s442_s11 = sand.u32 1, %s5544_s23   ;;  %p5546_p10 = scmp.ne.s32.totalorder %s5545_s28, 0 }
 0x128   : > { %s4442_s8 = sshll.u32 %s442_s11, 4 }
 0x129   : > { %s444_s5 = scalar_lea.vmem [#allocation10], %s4442_s8 }
 0x12a   : > { %3860 = dma.done.wait (%p5546_p10), %s432_s16, 256  }
 0x12b   : > { %3862 = vsyncadd (%p5546_p10), %s432_s16, 4294967040  ;;  %s450_s19 = scalar_lea.sflag [#allocation12], %s431_s15  ;;  %s453_s25 = scalar_lea.vmem [#allocation11], %s4442_s8 }
 0x12c   : > { %3864 = dma.done.wait (%p5546_p10), %s450_s19, 512  }
 0x12d   : > { %3866 = vsyncadd (%p5546_p10), %s450_s19, 4294966784  ;;  %s462_s1 = scalar_lea.vmem [#allocation13], %s4442_s8  ;;  %p5547_p5 = scmp.eq.s32.totalorder %s5543_s17, 0 }
 0x12f   : > { %3868 = dma.done.wait (%p5547_p5), [#allocation15], 1280   ;;  %p5548_p11 = pmov %p5547_p5 }
 0x130   : > { %s4460_s27 = scalar_lea.vmem [#allocation17], %s4427_s21  ;;  %s5549_s20 = sld [smem:[#allocation27_spill]] }
 0x131   : > { %3870 = vsyncadd (%p5548_p11), [#allocation15], 4294966016 }
 0x136   : > { %p3032_p8 = scmp.ne.s32.totalorder %s5549_s20, 0 }
 0x137   : > { %vm531_vm0 = vcmask (!%p3032_p8), 261120   ;;  %v3936_v0 = vmov (!%p3032_p8), -inf   ;;  %v3937_v1 = vmov (!%p3032_p8), 0.0  }
 0x138   : > { %530 = sbr.rel (%p3032_p8) target bundleno = 319 (0x13f), region = 80  ;;  %532 = vst.msk [vmem:[#allocation2] sm:$0xff] (!%p3032_p8), %vm531_vm0, %v3936_v0  ;;  %533 = vst.msk [vmem:[#allocation2 + $0x8] sm:$0xff] (!%p3032_p8), %vm531_vm0, %v3936_v0 }
 0x139   : > { %534 = vst.msk [vmem:[#allocation3] sm:$0xff] (!%p3032_p8), %vm531_vm0, %v3937_v1  ;;  %535 = vst.msk [vmem:[#allocation3 + $0x8] sm:$0xff] (!%p3032_p8), %vm531_vm0, %v3937_v1 }
 0x13a   : > { %536 = vst.msk [vmem:[#allocation4] sm:$0xff] (!%p3032_p8), %vm531_vm0, %v3937_v1  ;;  %537 = vst.msk [vmem:[#allocation4 + $0x8] sm:$0xff] (!%p3032_p8), %vm531_vm0, %v3937_v1 }
 0x13f PF: > { %v792_v2 = vld [vmem:[#allocation14] sm:$0xff]  ;;  %v793_v3 = vld [vmem:[#allocation14 + $0x8] sm:$0xff]  ;;  %v554_v4 = vlaneseq  ;;  %v3938_v6 = vmov 1966171168   ;;  %vm794_vm1 = vcmask 130048   ;;  %s3939_s14 = smov 96  }
 0x140   : > { %v3294_v5 = vpack.c.bf16 %v793_v3, %v792_v2  ;;  %v552_v7 = vunpack.c.l.s4 %v3938_v6  ;;  %v540_v10 = vld [vmem:[%s435_s24] sm:$0xff]  ;;  %v4477_v18 = vld [vmem:[%s453_s25 + $0x8] sm:$0xff]  ;;  %vm1560_vm2 = vcmask 523264   ;;  %vm1884_vm3 = vcmask 261120   ;;  %s5607_s3 = sld [smem:[#allocation27_spill]] }
 0x141   : > { %v555_v8 = vshrl.u32 %v554_v4, 7  ;;  %v550_v12 = vcombine.high %v540_v10, %v540_v10  ;;  %v4473_v17 = vld [vmem:[%s453_s25] sm:$0xff]  ;;  %v541_v49 = vld [vmem:[%s435_s24 + $0x8] sm:$0xff]  ;;  %vm2045_vm4 = vcmask 1041409   ;;  %vm2047_vm5 = vcmask 1042434  }
 0x142   : > { %3295 = vmatprep.subr.bf16.mxu0 %v3294_v5  ;;  %v553_v9 = vunpack.c.0.s8 %v552_v7  ;;  %vm2049_vm6 = vcmask 1043459   ;;  %vm2051_vm7 = vcmask 1044484   ;;  %vm2053_vm8 = vcmask 1045509  }
 0x143   : > { %3297 = vmatpush3.bf16.msra.mxu0 %v3294_v5  ;;  %v4468_v14 = vsub.s32 0, %v555_v8  ;;  %vm2055_vm9 = vcmask 1046534   ;;  %vm2057_vm10 = vcmask 1047559  }
 0x144   : > { %v4465_v11 = vsub.s32 %v553_v9, %v555_v8  ;;  %v599_v8 = vcombine.high %v541_v49, %v541_v49 }
 0x146   : > { %v557_v13 = vrot.slane %v540_v10, %v4465_v11  ;;  %v564_v19 = vrot.slane %v550_v12, %v4465_v11  ;;  %v606_v52 = vrot.slane %v541_v49, %v4465_v11  ;;  %p3097_p7 = scmp.ne.s32.totalorder %s5607_s3, 1 }
 0x148   : > { %v565_v15 = vcombine.high %v557_v13, %v557_v13  ;;  %v573_v16 = vrot.slane %v557_v13, %v4465_v11  ;;  %v580_v28 = vrot.slane %v564_v19, %v4465_v11  ;;  %v566_v29 = vcombine.high %v564_v19, %v564_v19 }
 0x149   : > { %v622_v59 = vrot.slane %v606_v52, %v4465_v11  ;;  %v614_v63 = vcombine.high %v606_v52, %v606_v52  ;;  %v613_v19 = vrot.slane %v599_v8, %v4465_v11 }
 0x14a   : > { %v595_v20 = vcombine.high %v573_v16, %v573_v16  ;;  %v651_v21 = vrot.slane %v573_v16, %v4468_v14  ;;  %v587_v22 = vrot.slane %v565_v15, %v4465_v11  ;;  %v667_v41 = vrot.slane %v580_v28, %v4468_v14 }
 0x14b   : > { %v594_v42 = vrot.slane %v566_v29, %v4465_v11  ;;  %v596_v48 = vcombine.high %v580_v28, %v580_v28  ;;  %v683_v4 = vrot.slane %v622_v59, %v4468_v14  ;;  %v636_v5 = vrot.slane %v614_v63, %v4465_v11  ;;  %v1553_v63 = vld [vmem:[#allocation16 + $0x8] sm:$0xff] }
 0x14c   : > { %v728_v23 = vsub.f32 %v651_v21, %v4473_v17  ;;  %v729_v24 = vsub.f32 %v651_v21, %v4477_v18  ;;  %v655_v25 = vrot.slane %v587_v22, %v4468_v14  ;;  %v659_v26 = vrot.slane %v595_v20, %v4468_v14 }
 0x14d   : > { %v597_v27 = vcombine.high %v587_v22, %v587_v22  ;;  %v736_v46 = vsub.f32 %v667_v41, %v4473_v17  ;;  %v671_v47 = vrot.slane %v594_v42, %v4468_v14  ;;  %v737_v51 = vsub.f32 %v667_v41, %v4477_v18 }
 0x14e   : > { %v760_v30 = vmax.f32 %v728_v23, 0.0  ;;  %v761_v31 = vmax.f32 %v729_v24, 0.0  ;;  %v730_v32 = vsub.f32 %v655_v25, %v4473_v17  ;;  %v731_v33 = vsub.f32 %v655_v25, %v4477_v18 }
 0x14f   : > { %v732_v34 = vsub.f32 %v659_v26, %v4473_v17  ;;  %v663_v35 = vrot.slane %v597_v27, %v4468_v14  ;;  %v733_v38 = vsub.f32 %v659_v26, %v4477_v18  ;;  %v768_v53 = vmax.f32 %v736_v46, 0.0 }
 0x150   : > { %3182 = vmatprep.mubr.msk.f32.mxu0 %vm794_vm1, %v760_v30  ;;  %v762_v36 = vmax.f32 %v730_v32, 0.0  ;;  %v763_v37 = vmax.f32 %v731_v33, 0.0  ;;  %v738_v54 = vsub.f32 %v671_v47, %v4473_v17  ;;  %v675_v55 = vrot.slane %v596_v48, %v4468_v14 }
 0x151   : > { %3183 = vmatmul.mubr.msk.f32.vlgmr.msra.gmra.mrb[0].mxu0 %vm794_vm1, %v761_v31  ;;  %v764_v39 = vmax.f32 %v732_v34, 0.0  ;;  %v734_v40 = vsub.f32 %v663_v35, %v4473_v17  ;;  %v765_v43 = vmax.f32 %v733_v38, 0.0  ;;  %v735_v44 = vsub.f32 %v663_v35, %v4477_v18 }
 0x152   : > { %3185 = vmatprep.mubr.msk.f32.mxu0 %vm794_vm1, %v762_v36  ;;  %v598_v56 = vcombine.high %v594_v42, %v594_v42  ;;  %v769_v57 = vmax.f32 %v737_v51, 0.0  ;;  %v739_v58 = vsub.f32 %v671_v47, %v4477_v18  ;;  %v770_v60 = vmax.f32 %v738_v54, 0.0 }
 0x153   : > { %v766_v45 = vmax.f32 %v734_v40, 0.0  ;;  %v767_v50 = vmax.f32 %v735_v44, 0.0  ;;  %v740_v61 = vsub.f32 %v675_v55, %v4473_v17  ;;  %v741_v1 = vsub.f32 %v675_v55, %v4477_v18 }
 0x154   : > { %v679_v62 = vrot.slane %v598_v56, %v4468_v14  ;;  %v771_v0 = vmax.f32 %v739_v58, 0.0  ;;  %v744_v10 = vsub.f32 %v683_v4, %v4473_v17  ;;  %v687_v12 = vrot.slane %v636_v5, %v4468_v14 }
 0x155   : > { %3186 = vmatmul.mubr.msk.f32.gmra.mrb[2].mxu0 %vm794_vm1, %v763_v37  ;;  %v772_v2 = vmax.f32 %v740_v61, 0.0  ;;  %v773_v6 = vmax.f32 %v741_v1, 0.0  ;;  %v644_v13 = vcombine.high %v622_v59, %v622_v59  ;;  %v745_v16 = vsub.f32 %v683_v4, %v4477_v18 }
 0x156   : > { %3188 = vmatprep.mubr.msk.f32.mxu0 %vm794_vm1, %v764_v39  ;;  %v742_v3 = vsub.f32 %v679_v62, %v4473_v17  ;;  %v743_v7 = vsub.f32 %v679_v62, %v4477_v18  ;;  %v776_v20 = vmax.f32 %v744_v10, 0.0  ;;  %v746_v21 = vsub.f32 %v687_v12, %v4473_v17  ;;  %v1552_v62 = vld [vmem:[#allocation16] sm:$0xff] }
 0x157   : > { %v691_v22 = vrot.slane %v644_v13, %v4468_v14  ;;  %v646_v23 = vcombine.high %v636_v5, %v636_v5  ;;  %v777_v24 = vmax.f32 %v745_v16, 0.0  ;;  %v747_v25 = vsub.f32 %v687_v12, %v4477_v18  ;;  %v1558_v5 = vld [vmem:[#allocation16 + $0x30] sm:$0xff] }
 0x158   : > { %v774_v9 = vmax.f32 %v742_v3, 0.0  ;;  %v775_v15 = vmax.f32 %v743_v7, 0.0  ;;  %v629_v26 = vrot.slane %v613_v19, %v4465_v11  ;;  %v778_v27 = vmax.f32 %v746_v21, 0.0  ;;  %v1557_v3 = vld [vmem:[#allocation16 + $0x28] sm:$0xff] }
 0x159   : > { %3189 = vmatmul.mubr.msk.f32.gmra.mrb[4].mxu0 %vm794_vm1, %v765_v43  ;;  %v748_v28 = vsub.f32 %v691_v22, %v4473_v17  ;;  %v695_v29 = vrot.slane %v646_v23, %v4468_v14  ;;  %v615_v30 = vcombine.high %v613_v19, %v613_v19  ;;  %v779_v31 = vmax.f32 %v747_v25, 0.0 }
 0x15a   : > { %3191 = vmatprep.mubr.msk.f32.mxu0 %vm794_vm1, %v766_v45  ;;  %v749_v32 = vsub.f32 %v691_v22, %v4477_v18  ;;  %v699_v35 = vrot.slane %v629_v26, %v4468_v14  ;;  %v645_v42 = vcombine.high %v629_v26, %v629_v26  ;;  %v3298_v1 = vpack.c.bf16 %v1553_v63, %v1552_v62  ;;  %v538_v62 = vld [vmem:[%s426_s7] sm:$0xff] }
 0x15b   : > { %v780_v33 = vmax.f32 %v748_v28, 0.0  ;;  %v750_v34 = vsub.f32 %v695_v29, %v4473_v17  ;;  %v643_v36 = vrot.slane %v615_v30, %v4465_v11  ;;  %v751_v38 = vsub.f32 %v695_v29, %v4477_v18  ;;  %v4631_v28 = vld [vmem:[%s462_s1 + $0x8] sm:$0xff]  ;;  %v4635_v30 = vld [vmem:[%s462_s1] sm:$0xff] }
 0x15c   : > { %v781_v37 = vmax.f32 %v749_v32, 0.0  ;;  %v752_v40 = vsub.f32 %v699_v35, %v4473_v17  ;;  %v753_v44 = vsub.f32 %v699_v35, %v4477_v18  ;;  %v707_v47 = vrot.slane %v645_v42, %v4468_v14  ;;  %3314 = vmatprep.subr.bf16.mxu1 %v3298_v1  ;;  %3299 = vmatprep.subr.bf16.mxu0 %v3298_v1 }
 0x15d   : > { %3192 = vmatmul.mubr.msk.f32.gmra.mrb[6].mxu0 %vm794_vm1, %v767_v50  ;;  %v782_v39 = vmax.f32 %v750_v34, 0.0  ;;  %v703_v41 = vrot.slane %v643_v36, %v4468_v14  ;;  %v783_v43 = vmax.f32 %v751_v38, 0.0  ;;  %v647_v48 = vcombine.high %v643_v36, %v643_v36  ;;  %3318 = vmatpush3.bf16.msra.mxu1 %v3298_v1 }
 0x15e   : > { %3194 = vmatprep.mubr.msk.f32.mxu0 %vm794_vm1, %v768_v53  ;;  %v784_v45 = vmax.f32 %v752_v40, 0.0  ;;  %v785_v49 = vmax.f32 %v753_v44, 0.0  ;;  %v756_v52 = vsub.f32 %v707_v47, %v4473_v17  ;;  %v757_v55 = vsub.f32 %v707_v47, %v4477_v18  ;;  %3301 = vmatpush3.bf16.msra.mxu0 %v3298_v1 }
 0x15f   : > { %v754_v46 = vsub.f32 %v703_v41, %v4473_v17  ;;  %v755_v50 = vsub.f32 %v703_v41, %v4477_v18  ;;  %v711_v53 = vrot.slane %v647_v48, %v4468_v14  ;;  %v1157_v63 = vrot.slane %v538_v62, %v4465_v11 }
 0x160   : > { %v788_v56 = vmax.f32 %v756_v52, 0.0  ;;  %v789_v58 = vmax.f32 %v757_v55, 0.0 }
 0x161   : > { %3195 = vmatmul.mubr.msk.f32.gmra.mrb[8].mxu0 %vm794_vm1, %v769_v57  ;;  %v786_v51 = vmax.f32 %v754_v46, 0.0  ;;  %v787_v54 = vmax.f32 %v755_v50, 0.0  ;;  %v758_v57 = vsub.f32 %v711_v53, %v4473_v17  ;;  %v759_v59 = vsub.f32 %v711_v53, %v4477_v18  ;;  %v1555_v17 = vld [vmem:[#allocation16 + $0x18] sm:$0xff]  ;;  %v1556_v18 = vld [vmem:[#allocation16 + $0x20] sm:$0xff] }
 0x162   : > { %3197 = vmatprep.mubr.msk.f32.mxu0 %vm794_vm1, %v770_v60  ;;  %v3306_v4 = vpack.c.bf16 %v1557_v3, %v1556_v18  ;;  %v4715_v3 = vld [vmem:[%s444_s5 + $0x8] sm:$0xff] }
 0x163   : > { %v790_v60 = vmax.f32 %v758_v57, 0.0  ;;  %v791_v61 = vmax.f32 %v759_v59, 0.0 }
 0x165   : > { %3198 = vmatmul.mubr.msk.f32.gmra.mrb[10].mxu0 %vm794_vm1, %v771_v0  ;;  %v1554_v0 = vld [vmem:[#allocation16 + $0x10] sm:$0xff] }
 0x166   : > { %3200 = vmatprep.mubr.msk.f32.mxu0 %vm794_vm1, %v772_v2  ;;  %v3302_v2 = vpack.c.bf16 %v1555_v17, %v1554_v0  ;;  %v1165_v0 = vcombine.high %v1157_v63, %v1157_v63  ;;  %v1173_v17 = vrot.slane %v1157_v63, %v4465_v11 }
 0x168   : > { %3315 = vmatprep.subr.bf16.mxu1 %v3302_v2  ;;  %3303 = vmatprep.subr.bf16.mxu0 %v3302_v2  ;;  %v1187_v1 = vrot.slane %v1165_v0, %v4465_v11  ;;  %v1195_v18 = vcombine.high %v1173_v17, %v1173_v17 }
 0x169   : > { %3201 = vmatmul.mubr.msk.f32.gmra.mrb[12].mxu0 %vm794_vm1, %v773_v6  ;;  %3319 = vmatpush3.bf16.msra.mxu1 %v3302_v2  ;;  %v1559_v6 = vld [vmem:[#allocation16 + $0x38] sm:$0xff] }
 0x16a   : > { %3203 = vmatprep.mubr.msk.f32.mxu0 %vm794_vm1, %v774_v9  ;;  %3305 = vmatpush3.bf16.msra.mxu0 %v3302_v2  ;;  %v3310_v7 = vpack.c.bf16 %v1559_v6, %v1558_v5  ;;  %v1255_v2 = vrot.slane %v1187_v1, %v4468_v14  ;;  %v4719_v5 = vld [vmem:[%s444_s5] sm:$0xff] }
 0x16b   : > { %3316 = vmatprep.subr.bf16.mxu1 %v3306_v4  ;;  %3307 = vmatprep.subr.bf16.mxu0 %v3306_v4 }
 0x16d   : > { %3204 = vmatmul.mubr.msk.f32.gmra.mrb[14].mxu0 %vm794_vm1, %v775_v15  ;;  %3320 = vmatpush3.bf16.msra.mxu1 %v3306_v4 }
 0x16e   : > { %3206 = vmatprep.mubr.msk.f32.mxu0 %vm794_vm1, %v776_v20  ;;  %3309 = vmatpush3.bf16.msra.mxu0 %v3306_v4  ;;  %v1150_v4 = vcombine.high %v538_v62, %v538_v62 }
 0x16f   : > { %3317 = vmatprep.subr.bf16.mxu1 %v3310_v7  ;;  %3311 = vmatprep.subr.bf16.mxu0 %v3310_v7 }
 0x171   : > { %3207 = vmatmul.mubr.msk.f32.gmra.mrb[16].mxu0 %vm794_vm1, %v777_v24  ;;  %3321 = vmatpush3.bf16.msra.mxu1 %v3310_v7 }
 0x172   : > { %3209 = vmatprep.mubr.msk.f32.mxu0 %vm794_vm1, %v778_v27  ;;  %3313 = vmatpush3.bf16.msra.mxu0 %v3310_v7  ;;  %v1331_v7 = vsub.f32 %v1255_v2, %v4715_v3 }
 0x175   : > { %3210 = vmatmul.mubr.msk.f32.gmra.mrb[18].mxu0 %vm794_vm1, %v779_v31 }
 0x176   : > { %3212 = vmatprep.mubr.msk.f32.mxu0 %vm794_vm1, %v780_v33 }
 0x179   : > { %3213 = vmatmul.mubr.msk.f32.gmra.mrb[20].mxu0 %vm794_vm1, %v781_v37 }
 0x17a   : > { %3215 = vmatprep.mubr.msk.f32.mxu0 %vm794_vm1, %v782_v39 }
 0x17d   : > { %3216 = vmatmul.mubr.msk.f32.gmra.mrb[22].mxu0 %vm794_vm1, %v783_v43 }
 0x17e   : > { %3218 = vmatprep.mubr.msk.f32.mxu0 %vm794_vm1, %v784_v45 }
 0x181   : > { %3219 = vmatmul.mubr.msk.f32.gmra.mrb[24].mxu0 %vm794_vm1, %v785_v49 }
 0x182   : > { %3221 = vmatprep.mubr.msk.f32.mxu0 %vm794_vm1, %v786_v51 }
 0x185   : > { %3222 = vmatmul.mubr.msk.f32.gmra.mrb[26].mxu0 %vm794_vm1, %v787_v54 }
 0x186   : > { %3224 = vmatprep.mubr.msk.f32.mxu0 %vm794_vm1, %v788_v56 }
 0x189   : > { %3225 = vmatmul.mubr.msk.f32.gmra.mrb[28].mxu0 %vm794_vm1, %v789_v58 }
 0x18a   : > { %3227 = vmatprep.mubr.msk.f32.mxu0 %vm794_vm1, %v790_v60 }
 0x18d   : > { %3228 = vmatmul.mubr.msk.f32.gmra.mrb[30].mxu0 %vm794_vm1, %v791_v61 }
 0x224   : > { %v4571_v8 = vpop.f32.mrb[0].mxu0 }
 0x225   : > { %v4573_v9 = vpop.f32.mrb[1].mxu0 }
 0x228   : > { %v4575_v10 = vpop.f32.mrb[2].mxu0 }
 0x229   : > { %1398 = vrot.lane.b32.xlu0 %v4575_v10, %s3939_s14  ;;  %v4579_v12 = vpop.f32.mrb[3].mxu0 }
 0x22c   : > { %v4581_v13 = vpop.f32.mrb[4].mxu0 }
 0x22d   : > { %1396 = vrot.lane.b32.xlu0 %v4579_v12, %s3939_s14  ;;  %1402 = vrot.lane.b32.xlu1 %v4581_v13, %s3939_s14  ;;  %v4587_v15 = vpop.f32.mrb[5].mxu0 }
 0x230   : > { %v4589_v16 = vpop.f32.mrb[6].mxu0 }
 0x231   : > { %1392 = vrot.lane.b32.xlu0 %v4573_v9, %s3939_s14  ;;  %1400 = vrot.lane.b32.xlu1 %v4587_v15, %s3939_s14  ;;  %v4595_v19 = vpop.f32.mrb[7].mxu0 }
 0x234   : > { %v4597_v20 = vpop.f32.mrb[8].mxu0 }
 0x235   : > { %1394 = vrot.lane.b32.xlu1 %v4571_v8, %s3939_s14  ;;  %1404 = vrot.lane.b32.xlu0 %v4595_v19, %s3939_s14  ;;  %v4603_v21 = vpop.f32.mrb[9].mxu0 }
 0x238   : > { %v4605_v22 = vpop.f32.mrb[10].mxu0 }
 0x239   : > { %1406 = vrot.lane.b32.xlu1 %v4589_v16, %s3939_s14  ;;  %1408 = vrot.lane.b32.xlu0 %v4603_v21, %s3939_s14  ;;  %v4611_v23 = vpop.f32.mrb[11].mxu0 }
 0x23c   : > { %v4613_v24 = vpop.f32.mrb[12].mxu0 }
 0x23d   : > { %1410 = vrot.lane.b32.xlu1 %v4597_v20, %s3939_s14  ;;  %1412 = vrot.lane.b32.xlu0 %v4611_v23, %s3939_s14  ;;  %v4619_v25 = vpop.f32.mrb[13].mxu0 }
 0x240   : > { %v4621_v26 = vpop.f32.mrb[14].mxu0 }
 0x241   : > { %1414 = vrot.lane.b32.xlu1 %v4605_v22, %s3939_s14  ;;  %1416 = vrot.lane.b32.xlu0 %v4619_v25, %s3939_s14  ;;  %v4627_v27 = vpop.f32.mrb[15].mxu0 }
 0x244   : > { %v3208_v29 = vpop.f32.mrb[16].mxu0 }
 0x245   : > { %1418 = vrot.lane.b32.xlu1 %v4613_v24, %s3939_s14  ;;  %1420 = vrot.lane.b32.xlu0 %v4627_v27, %s3939_s14  ;;  %v4642_v31 = vadd.f32 %v3208_v29, %v4631_v28  ;;  %v1037_v32 = vpop.f32.mrb[17].mxu0 }
 0x246   : > { %v4645_v33 = vadd.f32 %v1037_v32, %v4635_v30 }
 0x247   : > { %5550 = vst [vmem:[#allocation44_spill] sm:$0xff] %v4642_v31 }
 0x248   : > { %5551 = vst [vmem:[#allocation45_spill] sm:$0xff] %v4645_v33  ;;  %v3211_v34 = vpop.f32.mrb[18].mxu0 }
 0x249   : > { %1422 = vrot.lane.b32.xlu1 %v4621_v26, %s3939_s14  ;;  %1424 = vrot.lane.b32.xlu0 %v1037_v32, %s3939_s14  ;;  %v4651_v35 = vadd.f32 %v3211_v34, %v4631_v28  ;;  %v1047_v36 = vpop.f32.mrb[19].mxu0  ;;  %v1251_v32 = vrot.slane %v1173_v17, %v4468_v14 }
 0x24a   : > { %v4654_v37 = vadd.f32 %v1047_v36, %v4635_v30 }
 0x24b   : > { %5552 = vst [vmem:[#allocation46_spill] sm:$0xff] %v4651_v35  ;;  %v1329_v17 = vsub.f32 %v1251_v32, %v4715_v3  ;;  %v4979_v35 = vadd.f32 %v4621_v26, %v4631_v28 }
 0x24c   : > { %5553 = vst [vmem:[#allocation47_spill] sm:$0xff] %v4654_v37  ;;  %v3214_v38 = vpop.f32.mrb[20].mxu0 }
 0x24d   : > { %1426 = vrot.lane.b32.xlu1 %v3208_v29, %s3939_s14  ;;  %1428 = vrot.lane.b32.xlu0 %v1047_v36, %s3939_s14  ;;  %v4659_v39 = vadd.f32 %v3214_v38, %v4631_v28  ;;  %v1057_v40 = vpop.f32.mrb[21].mxu0  ;;  %v1259_v29 = vrot.slane %v1195_v18, %v4468_v14  ;;  %v1197_v36 = vcombine.high %v1187_v1, %v1187_v1 }
 0x24e   : > { %v4662_v41 = vadd.f32 %v1057_v40, %v4635_v30 }
 0x24f   : > { %5554 = vst [vmem:[#allocation48_spill] sm:$0xff] %v4659_v39 }
 0x250   : > { %5555 = vst [vmem:[#allocation49_spill] sm:$0xff] %v4662_v41  ;;  %v3217_v42 = vpop.f32.mrb[22].mxu0  ;;  %v4956_v41 = vadd.f32 %v4611_v23, %v4635_v30 }
 0x251   : > { %1430 = vrot.lane.b32.xlu1 %v3211_v34, %s3939_s14  ;;  %1432 = vrot.lane.b32.xlu0 %v1057_v40, %s3939_s14  ;;  %v4667_v43 = vadd.f32 %v3217_v42, %v4631_v28  ;;  %v1067_v44 = vpop.f32.mrb[23].mxu0  ;;  %v1330_v34 = vsub.f32 %v1255_v2, %v4719_v5 }
 0x252   : > { %v4670_v45 = vadd.f32 %v1067_v44, %v4635_v30 }
 0x253   : > { %5556 = vst [vmem:[#allocation50_spill] sm:$0xff] %v4667_v43 }
 0x254   : > { %5557 = vst [vmem:[#allocation51_spill] sm:$0xff] %v4670_v45  ;;  %v3220_v46 = vpop.f32.mrb[24].mxu0 }
 0x255   : > { %1434 = vrot.lane.b32.xlu1 %v3214_v38, %s3939_s14  ;;  %1436 = vrot.lane.b32.xlu0 %v1067_v44, %s3939_s14  ;;  %v4675_v47 = vadd.f32 %v3220_v46, %v4631_v28  ;;  %v1077_v48 = vpop.f32.mrb[25].mxu0  ;;  %v1164_v38 = vrot.slane %v1150_v4, %v4465_v11 }
 0x256   : > { %v4678_v49 = vadd.f32 %v1077_v48, %v4635_v30 }
 0x257   : > { %5558 = vst [vmem:[#allocation52_spill] sm:$0xff] %v4675_v47 }
 0x258   : > { %5559 = vst [vmem:[#allocation53_spill] sm:$0xff] %v4678_v49  ;;  %v3223_v50 = vpop.f32.mrb[26].mxu0 }
 0x259   : > { %1438 = vrot.lane.b32.xlu1 %v3217_v42, %s3939_s14  ;;  %1440 = vrot.lane.b32.xlu0 %v1077_v48, %s3939_s14  ;;  %v4683_v51 = vadd.f32 %v3223_v50, %v4631_v28  ;;  %v1087_v52 = vpop.f32.mrb[27].mxu0  ;;  %v1328_v48 = vsub.f32 %v1251_v32, %v4719_v5 }
 0x25a   : > { %v4686_v53 = vadd.f32 %v1087_v52, %v4635_v30 }
 0x25b   : > { %5560 = vst [vmem:[#allocation54_spill] sm:$0xff] %v4683_v51 }
 0x25c   : > { %5561 = vst [vmem:[#allocation55_spill] sm:$0xff] %v4686_v53  ;;  %v3226_v54 = vpop.f32.mrb[28].mxu0 }
 0x25d   : > { %1442 = vrot.lane.b32.xlu1 %v3220_v46, %s3939_s14  ;;  %1444 = vrot.lane.b32.xlu0 %v1087_v52, %s3939_s14  ;;  %v4691_v55 = vadd.f32 %v3226_v54, %v4631_v28  ;;  %v1097_v56 = vpop.f32.mrb[29].mxu0  ;;  %v1333_v46 = vsub.f32 %v1259_v29, %v4715_v3 }
 0x25e   : > { %v4694_v57 = vadd.f32 %v1097_v56, %v4635_v30 }
 0x25f   : > { %5562 = vst [vmem:[#allocation56_spill] sm:$0xff] %v4691_v55 }
 0x260   : > { %5563 = vst [vmem:[#allocation57_spill] sm:$0xff] %v4694_v57  ;;  %v3229_v58 = vpop.f32.mrb[30].mxu0 }
 0x261   : > { %1446 = vrot.lane.b32.xlu1 %v3223_v50, %s3939_s14  ;;  %1448 = vrot.lane.b32.xlu0 %v1097_v56, %s3939_s14  ;;  %v4699_v59 = vadd.f32 %v3229_v58, %v4631_v28  ;;  %v1107_v60 = vpop.f32.mrb[31].mxu0  ;;  %v1166_v50 = vcombine.high %v1164_v38, %v1164_v38  ;;  %v1263_v56 = vrot.slane %v1197_v36, %v4468_v14 }
 0x262   : > { %v4702_v61 = vadd.f32 %v1107_v60, %v4635_v30 }
 0x263   : > { %5564 = vst [vmem:[#allocation58_spill] sm:$0xff] %v4699_v59  ;;  %v1194_v2 = vrot.slane %v1166_v50, %v4465_v11  ;;  %v1335_v32 = vsub.f32 %v1263_v56, %v4715_v3 }
 0x264   : > { %5565 = vst [vmem:[#allocation59_spill] sm:$0xff] %v4702_v61 }
 0x265   : > { %1450 = vrot.lane.b32.xlu1 %v3226_v54, %s3939_s14  ;;  %1452 = vrot.lane.b32.xlu0 %v1107_v60, %s3939_s14  ;;  %v1332_v54 = vsub.f32 %v1259_v29, %v4719_v5 }
 0x269   : > { %1454 = vrot.lane.b32.xlu1 %v3229_v58, %s3939_s14  ;;  %v1180_v58 = vrot.slane %v1164_v38, %v4465_v11 }
 0x29b   : > { %v1399_v6 = vpop.permute.xlu0 %1398 }
 0x29c   : > { %v1491_v40 = vadd.f32 %v1399_v6, %v1331_v7  ;;  %v1334_v6 = vsub.f32 %v1263_v56, %v4719_v5  ;;  %v1267_v7 = vrot.slane %v1180_v58, %v4468_v14 }
 0x29e   : > { %v1523_v62 = vmax.f32 %v1491_v40, 0.0  ;;  %v1336_v50 = vsub.f32 %v1267_v7, %v4719_v5 }
 0x29f   : > { %v1397_v42 = vpop.permute.xlu0 %1396  ;;  %v1403_v44 = vpop.permute.xlu1 %1402 }
 0x2a0   : > { %v1490_v52 = vadd.f32 %v1397_v42, %v1330_v34  ;;  %v1493_v63 = vadd.f32 %v1403_v44, %v1333_v46  ;;  %v1271_v42 = vrot.slane %v1194_v2, %v4468_v14  ;;  %v1196_v44 = vcombine.high %v1180_v58, %v1180_v58 }
 0x2a2   : > { %v1522_v60 = vmax.f32 %v1490_v52, 0.0  ;;  %v1525_v36 = vmax.f32 %v1493_v63, 0.0  ;;  %v4745_v52 = vld [vmem:[%s426_s7 + $0x8] sm:$0xff]  ;;  %v1337_v63 = vsub.f32 %v1267_v7, %v4715_v3  ;;  %v1338_v58 = vsub.f32 %v1271_v42, %v4719_v5 }
 0x2a3   : > { %v1393_v0 = vpop.permute.xlu0 %1392  ;;  %v1401_v1 = vpop.permute.xlu1 %1400  ;;  %v1339_v7 = vsub.f32 %v1271_v42, %v4715_v3 }
 0x2a4   : > { %v1488_v18 = vadd.f32 %v1393_v0, %v1328_v48  ;;  %v1492_v4 = vadd.f32 %v1401_v1, %v1332_v54  ;;  %3249 = vmatprep.mubr.msk.f32.mxu1 %vm1560_vm2, %v1522_v60  ;;  %v1275_v0 = vrot.slane %v1196_v44, %v4468_v14  ;;  %v1198_v1 = vcombine.high %v1194_v2, %v1194_v2 }
 0x2a5   : > { %3250 = vmatmul.mubr.msk.f32.vlgmr.msra.gmra.mrb[0].mxu1 %vm1560_vm2, %v1523_v62 }
 0x2a6   : > { %v1520_v29 = vmax.f32 %v1488_v18, 0.0  ;;  %v1524_v34 = vmax.f32 %v1492_v4, 0.0  ;;  %v1206_v4 = vrot.slane %v4745_v52, %v4465_v11 }
 0x2a7   : > { %v1395_v38 = vpop.permute.xlu1 %1394  ;;  %v1405_v40 = vpop.permute.xlu0 %1404 }
 0x2a8   : > { %v1489_v46 = vadd.f32 %v1395_v38, %v1329_v17  ;;  %3246 = vmatprep.mubr.msk.f32.mxu0 %vm1560_vm2, %v1520_v29  ;;  %3252 = vmatprep.mubr.msk.f32.mxu1 %vm1560_vm2, %v1524_v34  ;;  %v1494_v48 = vadd.f32 %v1405_v40, %v1334_v6  ;;  %v1340_v38 = vsub.f32 %v1275_v0, %v4719_v5 }
 0x2a9   : > { %3253 = vmatmul.mubr.msk.f32.gmra.mrb[2].mxu1 %vm1560_vm2, %v1525_v36  ;;  %v1214_v40 = vcombine.high %v1206_v4, %v1206_v4 }
 0x2aa   : > { %v1521_v54 = vmax.f32 %v1489_v46, 0.0  ;;  %v1526_v60 = vmax.f32 %v1494_v48, 0.0  ;;  %v1222_v46 = vrot.slane %v1206_v4, %v4465_v11 }
 0x2ab   : > { %v1407_v62 = vpop.permute.xlu1 %1406  ;;  %v1409_v56 = vpop.permute.xlu0 %1408  ;;  %v1236_v42 = vrot.slane %v1214_v40, %v4465_v11  ;;  %v1199_v40 = vcombine.high %v4745_v52, %v4745_v52 }
 0x2ac   : > { %v1495_v17 = vadd.f32 %v1407_v62, %v1335_v32  ;;  %3247 = vmatmul.mubr.msk.f32.vlgmr.msra.gmra.mrb[32].mxu0 %vm1560_vm2, %v1521_v54  ;;  %v1496_v18 = vadd.f32 %v1409_v56, %v1336_v50  ;;  %3255 = vmatprep.mubr.msk.f32.mxu1 %vm1560_vm2, %v1526_v60  ;;  %v1279_v32 = vrot.slane %v1198_v1, %v4468_v14 }
 0x2ad   : > { %v1341_v62 = vsub.f32 %v1275_v0, %v4715_v3  ;;  %v1283_v1 = vrot.slane %v1222_v46, %v4468_v14  ;;  %v1287_v0 = vrot.slane %v1236_v42, %v4468_v14 }
 0x2ae   : > { %v1527_v6 = vmax.f32 %v1495_v17, 0.0  ;;  %v1528_v29 = vmax.f32 %v1496_v18, 0.0 }
 0x2af   : > { %v1411_v34 = vpop.permute.xlu1 %1410  ;;  %v1413_v36 = vpop.permute.xlu0 %1412 }
 0x2b0   : > { %v1497_v44 = vadd.f32 %v1411_v34, %v1337_v63  ;;  %3256 = vmatmul.mubr.msk.f32.gmra.mrb[4].mxu1 %vm1560_vm2, %v1527_v6  ;;  %v1498_v2 = vadd.f32 %v1413_v36, %v1338_v58  ;;  %v1342_v58 = vsub.f32 %v1279_v32, %v4719_v5  ;;  %v1244_v34 = vcombine.high %v1222_v46, %v1222_v46 }
 0x2b1   : > { %3258 = vmatprep.mubr.msk.f32.mxu1 %vm1560_vm2, %v1528_v29  ;;  %v1343_v29 = vsub.f32 %v1279_v32, %v4715_v3  ;;  %v1345_v32 = vsub.f32 %v1283_v1, %v4715_v3 }
 0x2b2   : > { %v1529_v48 = vmax.f32 %v1497_v44, 0.0  ;;  %v1530_v50 = vmax.f32 %v1498_v2, 0.0  ;;  %v1291_v46 = vrot.slane %v1244_v34, %v4468_v14 }
 0x2b3   : > { %v1415_v54 = vpop.permute.xlu1 %1414  ;;  %v1417_v60 = vpop.permute.xlu0 %1416 }
 0x2b4   : > { %v1499_v56 = vadd.f32 %v1415_v54, %v1339_v7  ;;  %3259 = vmatmul.mubr.msk.f32.gmra.mrb[6].mxu1 %vm1560_vm2, %v1529_v48  ;;  %v1500_v63 = vadd.f32 %v1417_v60, %v1340_v38  ;;  %v1344_v38 = vsub.f32 %v1283_v1, %v4719_v5  ;;  %v1346_v54 = vsub.f32 %v1287_v0, %v4719_v5 }
 0x2b5   : > { %3261 = vmatprep.mubr.msk.f32.mxu1 %vm1560_vm2, %v1530_v50  ;;  %v1348_v1 = vsub.f32 %v1291_v46, %v4719_v5 }
 0x2b6   : > { %v1531_v17 = vmax.f32 %v1499_v56, 0.0  ;;  %v1532_v18 = vmax.f32 %v1500_v63, 0.0  ;;  %v1246_v56 = vcombine.high %v1236_v42, %v1236_v42  ;;  %v1213_v63 = vrot.slane %v1199_v40, %v4465_v11 }
 0x2b7   : > { %v1419_v4 = vpop.permute.xlu1 %1418  ;;  %v1421_v6 = vpop.permute.xlu0 %1420 }
 0x2b8   : > { %v1501_v36 = vadd.f32 %v1419_v4, %v1341_v62  ;;  %3262 = vmatmul.mubr.msk.f32.gmra.mrb[8].mxu1 %vm1560_vm2, %v1531_v17  ;;  %v1502_v7 = vadd.f32 %v1421_v6, %v1342_v58  ;;  %v1347_v4 = vsub.f32 %v1287_v0, %v4715_v3  ;;  %v1215_v6 = vcombine.high %v1213_v63, %v1213_v63 }
 0x2b9   : > { %3264 = vmatprep.mubr.msk.f32.mxu1 %vm1560_vm2, %v1532_v18  ;;  %v1295_v34 = vrot.slane %v1246_v56, %v4468_v14  ;;  %v1229_v42 = vrot.slane %v1213_v63, %v4465_v11 }
 0x2ba   : > { %v1533_v44 = vmax.f32 %v1501_v36, 0.0  ;;  %v1534_v2 = vmax.f32 %v1502_v7, 0.0  ;;  %v1243_v0 = vrot.slane %v1215_v6, %v4465_v11 }
 0x2bb   : > { %v1423_v48 = vpop.permute.xlu1 %1422  ;;  %v1425_v50 = vpop.permute.xlu0 %1424 }
 0x2bc   : > { %v1503_v60 = vadd.f32 %v1423_v48, %v1343_v29  ;;  %3265 = vmatmul.mubr.msk.f32.gmra.mrb[10].mxu1 %vm1560_vm2, %v1533_v44  ;;  %v1504_v62 = vadd.f32 %v1425_v50, %v1344_v38 }
 0x2bd   : > { %3267 = vmatprep.mubr.msk.f32.mxu1 %vm1560_vm2, %v1534_v2  ;;  %v1349_v2 = vsub.f32 %v1291_v46, %v4715_v3  ;;  %v1303_v46 = vrot.slane %v1243_v0, %v4468_v14 }
 0x2be   : > { %v1535_v52 = vmax.f32 %v1503_v60, 0.0  ;;  %v1536_v58 = vmax.f32 %v1504_v62, 0.0 }
 0x2bf   : > { %v1427_v17 = vpop.permute.xlu1 %1426  ;;  %v1429_v18 = vpop.permute.xlu0 %1428 }
 0x2c0   : > { %v1505_v36 = vadd.f32 %v1427_v17, %v1345_v32  ;;  %3268 = vmatmul.mubr.msk.f32.gmra.mrb[12].mxu1 %vm1560_vm2, %v1535_v52  ;;  %v1506_v29 = vadd.f32 %v1429_v18, %v1346_v54  ;;  %v1350_v32 = vsub.f32 %v1295_v34, %v4719_v5  ;;  %v1299_v54 = vrot.slane %v1229_v42, %v4468_v14 }
 0x2c1   : > { %3270 = vmatprep.mubr.msk.f32.mxu1 %vm1560_vm2, %v1536_v58  ;;  %v1351_v52 = vsub.f32 %v1295_v34, %v4715_v3 }
 0x2c2   : > { %v1537_v7 = vmax.f32 %v1505_v36, 0.0  ;;  %v1538_v38 = vmax.f32 %v1506_v29, 0.0  ;;  %v1352_v18 = vsub.f32 %v1299_v54, %v4719_v5 }
 0x2c3   : > { %v1431_v40 = vpop.permute.xlu1 %1430  ;;  %v1433_v44 = vpop.permute.xlu0 %1432 }
 0x2c4   : > { %v1507_v48 = vadd.f32 %v1431_v40, %v1347_v4  ;;  %3271 = vmatmul.mubr.msk.f32.gmra.mrb[14].mxu1 %vm1560_vm2, %v1537_v7  ;;  %v1508_v50 = vadd.f32 %v1433_v44, %v1348_v1  ;;  %v1245_v4 = vcombine.high %v1229_v42, %v1229_v42  ;;  %v1353_v7 = vsub.f32 %v1299_v54, %v4715_v3 }
 0x2c5   : > { %3273 = vmatprep.mubr.msk.f32.mxu1 %vm1560_vm2, %v1538_v38  ;;  %v1354_v38 = vsub.f32 %v1303_v46, %v4719_v5 }
 0x2c6   : > { %v1539_v60 = vmax.f32 %v1507_v48, 0.0  ;;  %v1540_v62 = vmax.f32 %v1508_v50, 0.0  ;;  %v1307_v44 = vrot.slane %v1245_v4, %v4468_v14 }
 0x2c7   : > { %v1435_v56 = vpop.permute.xlu1 %1434  ;;  %v1437_v63 = vpop.permute.xlu0 %1436 }
 0x2c8   : > { %v1509_v58 = vadd.f32 %v1435_v56, %v1349_v2  ;;  %3274 = vmatmul.mubr.msk.f32.gmra.mrb[16].mxu1 %vm1560_vm2, %v1539_v60  ;;  %v1510_v17 = vadd.f32 %v1437_v63, %v1350_v32  ;;  %v1247_v2 = vcombine.high %v1243_v0, %v1243_v0  ;;  %v1355_v60 = vsub.f32 %v1303_v46, %v4715_v3 }
 0x2c9   : > { %3276 = vmatprep.mubr.msk.f32.mxu1 %vm1560_vm2, %v1540_v62  ;;  %v1356_v56 = vsub.f32 %v1307_v44, %v4719_v5  ;;  %v1357_v46 = vsub.f32 %v1307_v44, %v4715_v3 }
 0x2ca   : > { %v1541_v1 = vmax.f32 %v1509_v58, 0.0  ;;  %v1542_v6 = vmax.f32 %v1510_v17, 0.0  ;;  %v1311_v63 = vrot.slane %v1247_v2, %v4468_v14 }
 0x2cb   : > { %v1439_v36 = vpop.permute.xlu1 %1438  ;;  %v1441_v29 = vpop.permute.xlu0 %1440 }
 0x2cc   : > { %v1511_v34 = vadd.f32 %v1439_v36, %v1351_v52  ;;  %3277 = vmatmul.mubr.msk.f32.gmra.mrb[18].mxu1 %vm1560_vm2, %v1541_v1  ;;  %v1512_v40 = vadd.f32 %v1441_v29, %v1352_v18  ;;  %v1358_v1 = vsub.f32 %v1311_v63, %v4719_v5 }
 0x2cd   : > { %3279 = vmatprep.mubr.msk.f32.mxu1 %vm1560_vm2, %v1542_v6 }
 0x2ce   : > { %v1543_v42 = vmax.f32 %v1511_v34, 0.0  ;;  %v1544_v48 = vmax.f32 %v1512_v40, 0.0  ;;  %v1359_v40 = vsub.f32 %v1311_v63, %v4715_v3 }
 0x2cf   : > { %v1443_v50 = vpop.permute.xlu1 %1442  ;;  %v1445_v32 = vpop.permute.xlu0 %1444 }
 0x2d0   : > { %v1513_v62 = vadd.f32 %v1443_v50, %v1353_v7  ;;  %3280 = vmatmul.mubr.msk.f32.gmra.mrb[20].mxu1 %vm1560_vm2, %v1543_v42  ;;  %v1514_v54 = vadd.f32 %v1445_v32, %v1354_v38 }
 0x2d1   : > { %3282 = vmatprep.mubr.msk.f32.mxu1 %vm1560_vm2, %v1544_v48 }
 0x2d2   : > { %v1545_v52 = vmax.f32 %v1513_v62, 0.0  ;;  %v1546_v0 = vmax.f32 %v1514_v54, 0.0 }
 0x2d3   : > { %v1447_v58 = vpop.permute.xlu1 %1446  ;;  %v1449_v17 = vpop.permute.xlu0 %1448 }
 0x2d4   : > { %v1515_v18 = vadd.f32 %v1447_v58, %v1355_v60  ;;  %3283 = vmatmul.mubr.msk.f32.gmra.mrb[22].mxu1 %vm1560_vm2, %v1545_v52  ;;  %v1516_v4 = vadd.f32 %v1449_v17, %v1356_v56 }
 0x2d5   : > { %3285 = vmatprep.mubr.msk.f32.mxu1 %vm1560_vm2, %v1546_v0 }
 0x2d6   : > { %v1547_v6 = vmax.f32 %v1515_v18, 0.0  ;;  %v1548_v36 = vmax.f32 %v1516_v4, 0.0 }
 0x2d7   : > { %v1451_v29 = vpop.permute.xlu1 %1450  ;;  %v1453_v7 = vpop.permute.xlu0 %1452 }
 0x2d8   : > { %v1517_v38 = vadd.f32 %v1451_v29, %v1357_v46  ;;  %3286 = vmatmul.mubr.msk.f32.gmra.mrb[24].mxu1 %vm1560_vm2, %v1547_v6  ;;  %v1518_v34 = vadd.f32 %v1453_v7, %v1358_v1 }
 0x2d9   : > { %3288 = vmatprep.mubr.msk.f32.mxu1 %vm1560_vm2, %v1548_v36 }
 0x2da   : > { %v1549_v2 = vmax.f32 %v1517_v38, 0.0  ;;  %v1550_v42 = vmax.f32 %v1518_v34, 0.0 }
 0x2db   : > { %v1455_v48 = vpop.permute.xlu1 %1454 }
 0x2dc   : > { %v1519_v44 = vadd.f32 %v1455_v48, %v1359_v40  ;;  %3289 = vmatmul.mubr.msk.f32.gmra.mrb[26].mxu1 %vm1560_vm2, %v1549_v2 }
 0x2dd   : > { %3291 = vmatprep.mubr.msk.f32.mxu1 %vm1560_vm2, %v1550_v42 }
 0x2de   : > { %v1551_v5 = vmax.f32 %v1519_v44, 0.0 }
 0x2e0   : > { %3292 = vmatmul.mubr.msk.f32.gmra.mrb[28].mxu1 %vm1560_vm2, %v1551_v5 }
 0x378   : > { %v4816_v50 = vpop.f32.mrb[0].mxu1 }
 0x379   : > { %v1895_v32 = vsel %vm1884_vm3, %v4816_v50, -inf  ;;  %v4820_v3 = vpop.f32.mrb[1].mxu1 }
 0x37a   : > { %v1894_v60 = vsel %vm1884_vm3, %v4820_v3, -inf }
 0x37b   : > { %v1896_v62 = vmax.f32 %v1894_v60, %v1895_v32 }
 0x37c   : > { %v4824_v54 = vpop.f32.mrb[2].mxu1 }
 0x37d   : > { %v1897_v56 = vrot.slane %v1896_v62, 4  ;;  %v1904_v63 = vsel %vm1884_vm3, %v4824_v54, -inf  ;;  %v4828_v52 = vpop.f32.mrb[3].mxu1 }
 0x37e   : > { %v1903_v0 = vsel %vm1884_vm3, %v4828_v52, -inf }
 0x37f   : > { %v1898_v58 = vmax.f32 %v1896_v62, %v1897_v56  ;;  %v1905_v17 = vmax.f32 %v1903_v0, %v1904_v63  ;;  %v4832_v18 = vpop.f32.mrb[32].mxu0 }
 0x380   : > { %v1886_v4 = vsel %vm1884_vm3, %v4832_v18, -inf  ;;  %v4836_v46 = vpop.f32.mrb[33].mxu0 }
 0x381   : > { %v1899_v1 = vrot.slane %v1898_v58, 2  ;;  %v1906_v6 = vrot.slane %v1905_v17, 4  ;;  %v1885_v36 = vsel %vm1884_vm3, %v4836_v46, -inf }
 0x382   : > { %v1887_v29 = vmax.f32 %v1885_v36, %v1886_v4 }
 0x383   : > { %v1907_v7 = vmax.f32 %v1905_v17, %v1906_v6  ;;  %v4840_v38 = vpop.f32.mrb[4].mxu1  ;;  %v1900_v42 = vmax.f32 %v1898_v58, %v1899_v1 }
 0x384   : > { %v1888_v34 = vrot.slane %v1887_v29, 4  ;;  %v1913_v40 = vsel %vm1884_vm3, %v4840_v38, -inf  ;;  %v4844_v2 = vpop.f32.mrb[5].mxu1 }
 0x385   : > { %v1908_v48 = vrot.slane %v1907_v7, 2  ;;  %v1912_v44 = vsel %vm1884_vm3, %v4844_v2, -inf  ;;  %v1901_v4 = vrot.slane %v1900_v42, 1 }
 0x386   : > { %v1889_v5 = vmax.f32 %v1887_v29, %v1888_v34  ;;  %v1914_v32 = vmax.f32 %v1912_v44, %v1913_v40 }
 0x387   : > { %v1909_v60 = vmax.f32 %v1907_v7, %v1908_v48  ;;  %v4848_v62 = vpop.f32.mrb[6].mxu1  ;;  %v1902_v61 = vmax.f32 %v1900_v42, %v1901_v4 }
 0x388   : > { %v1890_v56 = vrot.slane %v1889_v5, 2  ;;  %v1915_v63 = vrot.slane %v1914_v32, 4  ;;  %v1922_v0 = vsel %vm1884_vm3, %v4848_v62, -inf  ;;  %v4852_v17 = vpop.f32.mrb[7].mxu1 }
 0x389   : > { %v1921_v58 = vsel %vm1884_vm3, %v4852_v17, -inf  ;;  %v1910_v59 = vrot.slane %v1909_v60, 1 }
 0x38a   : > { %v1891_v1 = vmax.f32 %v1889_v5, %v1890_v56  ;;  %v1916_v6 = vmax.f32 %v1914_v32, %v1915_v63  ;;  %v1923_v36 = vmax.f32 %v1921_v58, %v1922_v0 }
 0x38b   : > { %v4856_v29 = vpop.f32.mrb[8].mxu1  ;;  %v1911_v0 = vmax.f32 %v1909_v60, %v1910_v59 }
 0x38c   : > { %v1892_v7 = vrot.slane %v1891_v1, 1  ;;  %v1917_v34 = vrot.slane %v1916_v6, 2  ;;  %v1924_v40 = vrot.slane %v1923_v36, 4  ;;  %v1931_v48 = vsel %vm1884_vm3, %v4856_v29, -inf  ;;  %v4860_v44 = vpop.f32.mrb[9].mxu1 }
 0x38d   : > { %v1930_v55 = vsel %vm1884_vm3, %v4860_v44, -inf }
 0x38e   : > { %v1893_v5 = vmax.f32 %v1891_v1, %v1892_v7  ;;  %v1918_v32 = vmax.f32 %v1916_v6, %v1917_v34  ;;  %v1925_v56 = vmax.f32 %v1923_v36, %v1924_v40  ;;  %v1932_v63 = vmax.f32 %v1930_v55, %v1931_v48 }
 0x38f   : > { %v4864_v58 = vpop.f32.mrb[10].mxu1 }
 0x390   : > { %v2046_v57 = vsel %vm2045_vm4, %v1902_v61, %v1893_v5  ;;  %v1919_v51 = vrot.slane %v1918_v32, 1  ;;  %v1926_v53 = vrot.slane %v1925_v56, 2  ;;  %v1933_v47 = vrot.slane %v1932_v63, 4  ;;  %v4867_v49 = vpop.f32.mrb[11].mxu1 }
 0x391   : > { %v2048_v42 = vsel %vm2047_vm5, %v1911_v0, %v2046_v57  ;;  %v1940_v4 = vsel %vm1884_vm3, %v4864_v58, -inf  ;;  %v1939_v1 = vsel %vm1884_vm3, %v4867_v49, -inf }
 0x392   : > { %v1920_v55 = vmax.f32 %v1918_v32, %v1919_v51  ;;  %v1927_v59 = vmax.f32 %v1925_v56, %v1926_v53  ;;  %v1934_v60 = vmax.f32 %v1932_v63, %v1933_v47  ;;  %v1941_v6 = vmax.f32 %v1939_v1, %v1940_v4 }
 0x393   : > { %v4874_v36 = vpop.f32.mrb[12].mxu1 }
 0x394   : > { %v2050_v61 = vsel %vm2049_vm6, %v1920_v55, %v2048_v42  ;;  %v1928_v7 = vrot.slane %v1927_v59, 1  ;;  %v1935_v34 = vrot.slane %v1934_v60, 2  ;;  %v1942_v40 = vrot.slane %v1941_v6, 4  ;;  %v4877_v48 = vpop.f32.mrb[13].mxu1 }
 0x395   : > { %v1949_v57 = vsel %vm1884_vm3, %v4874_v36, -inf  ;;  %v1948_v5 = vsel %vm1884_vm3, %v4877_v48, -inf }
 0x396   : > { %v1929_v51 = vmax.f32 %v1927_v59, %v1928_v7  ;;  %v1936_v53 = vmax.f32 %v1934_v60, %v1935_v34  ;;  %v1943_v47 = vmax.f32 %v1941_v6, %v1942_v40  ;;  %v1950_v32 = vmax.f32 %v1948_v5, %v1949_v57 }
 0x397   : > { %v4883_v56 = vpop.f32.mrb[14].mxu1  ;;  %v4894_v34 = vadd.f32 %v4571_v8, %v4631_v28 }
 0x398   : > { %v2052_v63 = vsel %vm2051_vm7, %v1929_v51, %v2050_v61  ;;  %v1937_v0 = vrot.slane %v1936_v53, 1  ;;  %v1944_v42 = vrot.slane %v1943_v47, 2  ;;  %v1951_v4 = vrot.slane %v1950_v32, 4  ;;  %v4886_v1 = vpop.f32.mrb[15].mxu1 }
 0x399   : > { %v1958_v55 = vsel %vm1884_vm3, %v4883_v56, -inf  ;;  %v1957_v43 = vsel %vm1884_vm3, %v4886_v1, -inf  ;;  %v4898_v61 = vadd.f32 %v4573_v9, %v4635_v30 }
 0x39a   : > { %v1938_v59 = vmax.f32 %v1936_v53, %v1937_v0  ;;  %v1945_v60 = vmax.f32 %v1943_v47, %v1944_v42  ;;  %v1952_v6 = vmax.f32 %v1950_v32, %v1951_v4  ;;  %v1959_v7 = vmax.f32 %v1957_v43, %v1958_v55 }
 0x39b   : > { %v4900_v40 = vpop.f32.mrb[16].mxu1  ;;  %v4907_v43 = vadd.f32 %v4575_v10, %v4631_v28  ;;  %v4915_v0 = vadd.f32 %v4579_v12, %v4635_v30  ;;  %v4919_v42 = vadd.f32 %v4581_v13, %v4631_v28  ;;  %v4923_v10 = vadd.f32 %v4587_v15, %v4635_v30 }
 0x39c   : > { %5566 = vst [vmem:[#allocation60_spill] sm:$0xff] %v4900_v40  ;;  %v2054_v57 = vsel %vm2053_vm8, %v1938_v59, %v2052_v63  ;;  %v1946_v5 = vrot.slane %v1945_v60, 1  ;;  %v1953_v51 = vrot.slane %v1952_v6, 2  ;;  %v1960_v45 = vrot.slane %v1959_v7, 4  ;;  %v4903_v39 = vpop.f32.mrb[17].mxu1 }
 0x39d   : > { %v1967_v8 = vsel %vm1884_vm3, %v4900_v40, -inf  ;;  %v1966_v9 = vsel %vm1884_vm3, %v4903_v39, -inf  ;;  %v4927_v4 = vadd.f32 %v4589_v16, %v4631_v28  ;;  %v4936_v13 = vadd.f32 %v4595_v19, %v4635_v30 }
 0x39e   : > { %v1947_v53 = vmax.f32 %v1945_v60, %v1946_v5  ;;  %v1954_v47 = vmax.f32 %v1952_v6, %v1953_v51  ;;  %v1961_v32 = vmax.f32 %v1959_v7, %v1960_v45  ;;  %v1968_v63 = vmax.f32 %v1966_v9, %v1967_v8  ;;  %v1882_v7 = vld [vmem:[#allocation2] sm:$0xff] }
 0x39f   : > { %v4929_v55 = vpop.f32.mrb[18].mxu1  ;;  %v4944_v9 = vadd.f32 %v4597_v20, %v4631_v28  ;;  %v4948_v19 = vadd.f32 %v4603_v21, %v4635_v30  ;;  %v4965_v21 = vadd.f32 %v4613_v24, %v4631_v28 }
 0x3a0   : > { %5567 = vst [vmem:[#allocation61_spill] sm:$0xff] %v4929_v55  ;;  %v2056_v45 = vsel %vm2055_vm9, %v1947_v53, %v2054_v57  ;;  %v1955_v59 = vrot.slane %v1954_v47, 1  ;;  %v1962_v60 = vrot.slane %v1961_v32, 2  ;;  %v1969_v12 = vrot.slane %v1968_v63, 4  ;;  %v4932_v6 = vpop.f32.mrb[19].mxu1 }
 0x3a1   : > { %5568 = vst [vmem:[#allocation62_spill] sm:$0xff] %v4932_v6  ;;  %v1976_v15 = vsel %vm1884_vm3, %v4929_v55, -inf  ;;  %v1975_v16 = vsel %vm1884_vm3, %v4932_v6, -inf  ;;  %v4952_v53 = vadd.f32 %v4605_v22, %v4631_v28 }
 0x3a2   : > { %v1956_v5 = vmax.f32 %v1954_v47, %v1955_v59  ;;  %v1963_v51 = vmax.f32 %v1961_v32, %v1962_v60  ;;  %v1970_v57 = vmax.f32 %v1968_v63, %v1969_v12  ;;  %v1977_v8 = vmax.f32 %v1975_v16, %v1976_v15 }
 0x3a3   : > { %v4958_v47 = vpop.f32.mrb[20].mxu1  ;;  %v4973_v15 = vadd.f32 %v4619_v25, %v4635_v30  ;;  %v4987_v25 = vadd.f32 %v4627_v27, %v4635_v30 }
 0x3a4   : > { %5569 = vst [vmem:[#allocation63_spill] sm:$0xff] %v4958_v47  ;;  %v2058_v32 = vsel %vm2057_vm10, %v1956_v5, %v2056_v45  ;;  %v1964_v63 = vrot.slane %v1963_v51, 1  ;;  %v1971_v59 = vrot.slane %v1970_v57, 2  ;;  %v1978_v20 = vrot.slane %v1977_v8, 4  ;;  %v4961_v60 = vpop.f32.mrb[21].mxu1 }
 0x3a5   : > { %5570 = vst [vmem:[#allocation64_spill] sm:$0xff] %v4961_v60  ;;  %v2068_v12 = vmax.f32 %v1882_v7, %v2058_v32  ;;  %v1985_v22 = vsel %vm1884_vm3, %v4958_v47, -inf  ;;  %v1984_v23 = vsel %vm1884_vm3, %v4961_v60, -inf }
 0x3a6   : > { %v1972_v45 = vmax.f32 %v1970_v57, %v1971_v59  ;;  %v1979_v16 = vmax.f32 %v1977_v8, %v1978_v20  ;;  %v4975_v5 = vmax.f32 %v1984_v23, %v1985_v22  ;;  %v1965_v57 = vmax.f32 %v1963_v51, %v1964_v63 }
 0x3a7   : > { %v2070_v24 = vsub.f32 %v1882_v7, %v2068_v12  ;;  %v2078_v32 = vcombine.high %v2068_v12, %v2068_v12  ;;  %v2085_v37 = vrot.slane %v2068_v12, %v4465_v11  ;;  %2752 = vst.msk [vmem:[#allocation2] sm:$0xff] %vm1884_vm3, %v2068_v12  ;;  %v4983_v31 = vpop.f32.mrb[22].mxu1 }
 0x3a8   : > { %5571 = vst [vmem:[#allocation65_spill] sm:$0xff] %v4983_v31  ;;  %v1973_v8 = vrot.slane %v1972_v45, 1  ;;  %v1980_v59 = vrot.slane %v1979_v16, 2  ;;  %v4989_v20 = vpop.f32.mrb[23].mxu1  ;;  %v1987_v12 = vrot.slane %v4975_v5, 4  ;;  %v4996_v47 = vsel %vm1884_vm3, %v4983_v31, -inf }
 0x3a9   : > { %v2072_v22 = vmul.f32 1.442695, %v2070_v24  ;;  %v2092_v26 = vrot.slane %v2078_v32, %v4465_v11  ;;  %v2093_v28 = vcombine.high %v2085_v37, %v2085_v37  ;;  %v2101_v7 = vrot.slane %v2085_v37, %v4465_v11 }
 0x3aa   : > { %v1974_v23 = vmax.f32 %v1972_v45, %v1973_v8  ;;  %v1981_v33 = vmax.f32 %v1979_v16, %v1980_v59 }
 0x3ab   : > { %3493 = vpow2.f32 %v2072_v22  ;;  %v2094_v27 = vcombine.high %v2092_v26, %v2092_v26  ;;  %v2108_v30 = vrot.slane %v2092_v26, %v4465_v11  ;;  %v2115_v51 = vrot.slane %v2093_v28, %v4465_v11  ;;  %v5000_v63 = vpop.f32.mrb[24].mxu1 }
 0x3ac   : > { %5572 = vst [vmem:[#allocation66_spill] sm:$0xff] %v5000_v63  ;;  %v2123_v24 = vcombine.high %v2101_v7, %v2101_v7  ;;  %v2179_v32 = vrot.slane %v2101_v7, %v4468_v14  ;;  %v2059_v37 = vsel %vm2045_vm4, %v1974_v23, %v1965_v57  ;;  %v1982_v45 = vrot.slane %v1981_v33, 1  ;;  %v5004_v16 = vpop.f32.mrb[25].mxu1 }
 0x3ad   : > { %v2122_v8 = vrot.slane %v2094_v27, %v4465_v11  ;;  %v2124_v59 = vcombine.high %v2108_v30, %v2108_v30  ;;  %v2125_v31 = vcombine.high %v2115_v51, %v2115_v51  ;;  %v2183_v22 = vrot.slane %v2115_v51, %v4468_v14 }
 0x3ae   : > { %v2187_v26 = vrot.slane %v2123_v24, %v4468_v14  ;;  %v2195_v28 = vrot.slane %v2108_v30, %v4468_v14  ;;  %v2256_v60 = vsub.f32 %v4836_v46, %v2179_v32  ;;  %v2257_v55 = vsub.f32 %v4832_v18, %v2179_v32 }
 0x3af   : > { %v2126_v7 = vcombine.high %v2122_v8, %v2122_v8  ;;  %v2191_v57 = vrot.slane %v2125_v31, %v4468_v14  ;;  %v2199_v23 = vrot.slane %v2122_v8, %v4468_v14  ;;  %v2203_v6 = vrot.slane %v2124_v59, %v4468_v14  ;;  %v5015_v27 = vpop.f32.mrb[26].mxu1 }
 0x3b0   : > { %5573 = vst [vmem:[#allocation67_spill] sm:$0xff] %v5015_v27  ;;  %v2258_v40 = vsub.f32 %v4820_v3, %v2183_v22  ;;  %v2259_v51 = vsub.f32 %v4816_v50, %v2183_v22  ;;  %v2260_v24 = vsub.f32 %v4828_v52, %v2187_v26  ;;  %v2261_v30 = vsub.f32 %v4824_v54, %v2187_v26  ;;  %v5021_v46 = vpop.f32.mrb[27].mxu1 }
 0x3b1   : > { %5574 = vst [vmem:[#allocation68_spill] sm:$0xff] %v5021_v46  ;;  %v2207_v18 = vrot.slane %v2126_v7, %v4468_v14  ;;  %v2262_v31 = vsub.f32 %v4844_v2, %v2191_v57  ;;  %v2263_v32 = vsub.f32 %v4840_v38, %v2191_v57  ;;  %v2264_v8 = vsub.f32 %v4852_v17, %v2195_v28 }
 0x3b2   : > { %v2265_v59 = vsub.f32 %v4848_v62, %v2195_v28  ;;  %v2266_v3 = vsub.f32 %v4860_v44, %v2199_v23  ;;  %v2267_v50 = vsub.f32 %v4856_v29, %v2199_v23  ;;  %v2268_v52 = vsub.f32 %v4867_v49, %v2203_v6 }
 0x3b3   : > { %v2269_v54 = vsub.f32 %v4864_v58, %v2203_v6  ;;  %v2270_v22 = vsub.f32 %v4877_v48, %v2207_v18  ;;  %v2271_v26 = vsub.f32 %v4874_v36, %v2207_v18  ;;  %v2288_v7 = vmul.f32 1.442695, %v2256_v60  ;;  %v5034_v2 = vpop.f32.mrb[28].mxu1 }
 0x3b4   : > { %5575 = vst [vmem:[#allocation69_spill] sm:$0xff] %v5034_v2  ;;  %v2290_v38 = vmul.f32 1.442695, %v2257_v55  ;;  %v2292_v57 = vmul.f32 1.442695, %v2258_v40  ;;  %v1988_v62 = vmax.f32 %v4975_v5, %v1987_v12  ;;  %v1983_v44 = vmax.f32 %v1981_v33, %v1982_v45  ;;  %v5044_v45 = vpop.f32.mrb[29].mxu1 }
 0x3b5   : > { %v2294_v17 = vmul.f32 1.442695, %v2259_v51  ;;  %v5037_v28 = vpop.eup %3493  ;;  %3495 = vpow2.f32 %v2288_v7  ;;  %v2296_v29 = vmul.f32 1.442695, %v2260_v24  ;;  %v1993_v49 = vsel %vm1884_vm3, %v4989_v20, -inf  ;;  %5576 = vst [vmem:[#allocation70_spill] sm:$0xff] %v5044_v45 }
 0x3b6   : > { %3497 = vpow2.f32 %v2290_v38  ;;  %v2298_v58 = vmul.f32 1.442695, %v2261_v30  ;;  %v2300_v48 = vmul.f32 1.442695, %v2262_v31  ;;  %v2302_v36 = vmul.f32 1.442695, %v2263_v32 }
 0x3b7   : > { %3499 = vpow2.f32 %v2292_v57  ;;  %v2304_v6 = vmul.f32 1.442695, %v2264_v8  ;;  %v2306_v60 = vmul.f32 1.442695, %v2265_v59  ;;  %v2308_v55 = vmul.f32 1.442695, %v2266_v3 }
 0x3b8   : > { %3501 = vpow2.f32 %v2294_v17  ;;  %v2310_v40 = vmul.f32 1.442695, %v2267_v50  ;;  %v2312_v23 = vmul.f32 1.442695, %v2268_v52  ;;  %v2314_v5 = vmul.f32 1.442695, %v2269_v54 }
 0x3b9   : > { %3503 = vpow2.f32 %v2296_v29  ;;  %v2316_v12 = vmul.f32 1.442695, %v2270_v22  ;;  %v2318_v51 = vmul.f32 1.442695, %v2271_v26  ;;  %v5042_v33 = vsel %vm2047_vm5, %v1983_v44, %v2059_v37  ;;  %v2352_v31 = vld [vmem:[#allocation3] sm:$0xff] }
 0x3ba   : > { %3505 = vpow2.f32 %v2298_v58  ;;  %v1989_v24 = vrot.slane %v1988_v62, 2  ;;  %v1995_v30 = vmax.f32 %v1993_v49, %v4996_v47  ;;  %v2003_v18 = vsel %vm1884_vm3, %v5000_v63, -inf }
 0x3bb   : > { %3507 = vpow2.f32 %v2300_v48  ;;  %v2002_v32 = vsel %vm1884_vm3, %v5004_v16, -inf  ;;  %v2012_v8 = vsel %vm1884_vm3, %v5015_v27, -inf  ;;  %v2011_v37 = vsel %vm1884_vm3, %v5021_v46, -inf }
 0x3bc   : > { %3509 = vpow2.f32 %v2302_v36  ;;  %v1990_v59 = vmax.f32 %v1988_v62, %v1989_v24  ;;  %v1996_v3 = vrot.slane %v1995_v30, 4  ;;  %v5055_v50 = vmax.f32 %v2002_v32, %v2003_v18 }
 0x3bd   : > { %3511 = vpow2.f32 %v2304_v6  ;;  %v5057_v47 = vmax.f32 %v2011_v37, %v2012_v8  ;;  %v2021_v52 = vsel %vm1884_vm3, %v5034_v2, -inf  ;;  %v2020_v54 = vsel %vm1884_vm3, %v5044_v45, -inf }
 0x3be   : > { %3513 = vpow2.f32 %v2306_v60  ;;  %v5064_v22 = vmul.f32 %v5037_v28, %v2352_v31  ;;  %v1991_v26 = vrot.slane %v1990_v59, 1  ;;  %v5066_v7 = vmax.f32 %v1995_v30, %v1996_v3 }
 0x3bf   : > { %v3496_v38 = vpop.eup %3495  ;;  %3515 = vpow2.f32 %v2308_v55  ;;  %v5070_v62 = vmax.f32 %v2020_v54, %v2021_v52 }
 0x3c0   : > { %v3498_v29 = vpop.eup %3497  ;;  %3517 = vpow2.f32 %v2310_v40  ;;  %v2356_v44 = vsel %vm1884_vm3, %v3496_v38, 0.0  ;;  %v2540_v49 = vmul.f32 %v3496_v38, %v4898_v61  ;;  %v5074_v58 = vmax.f32 %v1990_v59, %v1991_v26 }
 0x3c1   : > { %v3500_v48 = vpop.eup %3499  ;;  %3519 = vpow2.f32 %v2312_v23  ;;  %v2357_v36 = vsel %vm1884_vm3, %v3498_v29, 0.0  ;;  %v2541_v6 = vmul.f32 %v3498_v29, %v4894_v34 }
 0x3c2   : > { %v3502_v55 = vpop.eup %3501  ;;  %3521 = vpow2.f32 %v2314_v5  ;;  %v2358_v24 = vadd.f32 %v2357_v36, %v2356_v44  ;;  %v2365_v30 = vsel %vm1884_vm3, %v3500_v48, 0.0  ;;  %v5081_v40 = vmul.f32 %v3500_v48, %v4915_v0 }
 0x3c3   : > { %v3504_v18 = vpop.eup %3503  ;;  %3523 = vpow2.f32 %v2316_v12  ;;  %v2366_v61 = vsel %vm1884_vm3, %v3502_v55, 0.0  ;;  %v5085_v23 = vmul.f32 %v3502_v55, %v4907_v43  ;;  %v2572_v31 = vsel %vm1884_vm3, %v2540_v49, 0.0 }
 0x3c4   : > { %v3506_v34 = vpop.eup %3505  ;;  %3525 = vpow2.f32 %v2318_v51  ;;  %v2359_v32 = vrot.slane %v2358_v24, 4  ;;  %v2367_v8 = vadd.f32 %v2366_v61, %v2365_v30  ;;  %v2374_v5 = vsel %vm1884_vm3, %v3504_v18, 0.0 }
 0x3c5   : > { %v3508_v37 = vpop.eup %3507  ;;  %v2375_v59 = vsel %vm1884_vm3, %v3506_v34, 0.0  ;;  %v5091_v0 = vmul.f32 %v3504_v18, %v4923_v10  ;;  %v5094_v12 = vmul.f32 %v3506_v34, %v4919_v42  ;;  %v2573_v43 = vsel %vm1884_vm3, %v2541_v6, 0.0 }
 0x3c6   : > { %v3510_v3 = vpop.eup %3509  ;;  %v2360_v52 = vadd.f32 %v2359_v32, %v2358_v24  ;;  %v2368_v54 = vrot.slane %v2367_v8, 4  ;;  %v2376_v26 = vadd.f32 %v2375_v59, %v2374_v5  ;;  %v2383_v51 = vsel %vm1884_vm3, %v3508_v37, 0.0 }
 0x3c7   : > { %v3512_v38 = vpop.eup %3511  ;;  %v2384_v29 = vsel %vm1884_vm3, %v3510_v3, 0.0  ;;  %v5100_v44 = vmul.f32 %v3508_v37, %v4936_v13  ;;  %v5103_v10 = vmul.f32 %v3510_v3, %v4927_v4  ;;  %v5105_v49 = vadd.f32 %v2573_v43, %v2572_v31 }
 0x3c8   : > { %v3514_v42 = vpop.eup %3513  ;;  %v2361_v48 = vrot.slane %v2360_v52, 2  ;;  %v2369_v36 = vadd.f32 %v2368_v54, %v2367_v8  ;;  %v2377_v6 = vrot.slane %v2376_v26, 4  ;;  %v2385_v55 = vadd.f32 %v2384_v29, %v2383_v51 }
 0x3c9   : > { %v3516_v24 = vpop.eup %3515  ;;  %v2392_v30 = vsel %vm1884_vm3, %v3512_v38, 0.0  ;;  %v2393_v18 = vsel %vm1884_vm3, %v3514_v42, 0.0  ;;  %v5110_v61 = vmul.f32 %v3512_v38, %v4948_v19  ;;  %v5113_v13 = vmul.f32 %v3514_v42, %v4944_v9 }
 0x3ca   : > { %v3518_v4 = vpop.eup %3517  ;;  %v2362_v34 = vadd.f32 %v2361_v48, %v2360_v52  ;;  %v2370_v31 = vrot.slane %v2369_v36, 2  ;;  %v2378_v32 = vadd.f32 %v2377_v6, %v2376_v26  ;;  %v2386_v5 = vrot.slane %v2385_v55, 4 }
 0x3cb   : > { %v3520_v37 = vpop.eup %3519  ;;  %v2394_v8 = vadd.f32 %v2393_v18, %v2392_v30  ;;  %v2401_v59 = vsel %vm1884_vm3, %v3516_v24, 0.0  ;;  %v2402_v43 = vsel %vm1884_vm3, %v3518_v4, 0.0  ;;  %v5118_v3 = vmul.f32 %v3516_v24, %v4956_v41 }
 0x3cc   : > { %v3522_v54 = vpop.eup %3521  ;;  %v2363_v19 = vrot.slane %v2362_v34, 1  ;;  %v2371_v51 = vadd.f32 %v2370_v31, %v2369_v36  ;;  %v2379_v38 = vrot.slane %v2378_v32, 2  ;;  %v2387_v9 = vadd.f32 %v2386_v5, %v2385_v55 }
 0x3cd   : > { %v3524_v29 = vpop.eup %3523  ;;  %v2395_v42 = vrot.slane %v2394_v8, 4  ;;  %v2403_v52 = vadd.f32 %v2402_v43, %v2401_v59  ;;  %v2410_v26 = vsel %vm1884_vm3, %v3520_v37, 0.0  ;;  %v2411_v48 = vsel %vm1884_vm3, %v3522_v54, 0.0 }
 0x3ce   : > { %v3526_v6 = vpop.eup %3525  ;;  %v2364_v30 = vadd.f32 %v2363_v19, %v2362_v34  ;;  %v2372_v18 = vrot.slane %v2371_v51, 1  ;;  %v2380_v17 = vadd.f32 %v2379_v38, %v2378_v32  ;;  %v2388_v57 = vrot.slane %v2387_v9, 2 }
 0x3cf   : > { %v2396_v60 = vadd.f32 %v2395_v42, %v2394_v8  ;;  %v2404_v41 = vrot.slane %v2403_v52, 4  ;;  %v2412_v24 = vadd.f32 %v2411_v48, %v2410_v26  ;;  %v2419_v2 = vsel %vm1884_vm3, %v3524_v29, 0.0 }
 0x3d0   : > { %v2373_v36 = vadd.f32 %v2372_v18, %v2371_v51  ;;  %v2381_v31 = vrot.slane %v2380_v17, 1  ;;  %v2389_v55 = vadd.f32 %v2388_v57, %v2387_v9  ;;  %v2420_v5 = vsel %vm1884_vm3, %v3526_v6, 0.0 }
 0x3d1   : > { %v2397_v59 = vrot.slane %v2396_v60, 2  ;;  %v2405_v43 = vadd.f32 %v2404_v41, %v2403_v52  ;;  %v2413_v45 = vrot.slane %v2412_v24, 4  ;;  %v2421_v27 = vadd.f32 %v2420_v5, %v2419_v2 }
 0x3d2   : > { %v2382_v46 = vadd.f32 %v2381_v31, %v2380_v17  ;;  %v2390_v63 = vrot.slane %v2389_v55, 1  ;;  %v2516_v34 = vsel %vm2045_vm4, %v2373_v36, %v2364_v30  ;;  %v2551_v32 = vmul.f32 %v3518_v4, %v4952_v53 }
 0x3d3   : > { %v2398_v8 = vadd.f32 %v2397_v59, %v2396_v60  ;;  %v2406_v19 = vrot.slane %v2405_v43, 2  ;;  %v2414_v38 = vadd.f32 %v2413_v45, %v2412_v24  ;;  %v2422_v42 = vrot.slane %v2421_v27, 4 }
 0x3d4   : > { %v2391_v26 = vadd.f32 %v2390_v63, %v2389_v55  ;;  %v2517_v51 = vsel %vm2047_vm5, %v2382_v46, %v2516_v34  ;;  %v2552_v57 = vmul.f32 %v3520_v37, %v4973_v15  ;;  %v2553_v9 = vmul.f32 %v3522_v54, %v4965_v21 }
 0x3d5   : > { %v2399_v52 = vrot.slane %v2398_v8, 1  ;;  %v2407_v48 = vadd.f32 %v2406_v19, %v2405_v43  ;;  %v2415_v2 = vrot.slane %v2414_v38, 2  ;;  %v2423_v17 = vadd.f32 %v2422_v42, %v2421_v27 }
 0x3d6   : > { %v2518_v18 = vsel %vm2049_vm6, %v2391_v26, %v2517_v51  ;;  %v2554_v30 = vmul.f32 %v3524_v29, %v4987_v25  ;;  %v2555_v53 = vmul.f32 %v3526_v6, %v4979_v35  ;;  %v2575_v45 = vrot.slane %v5105_v49, 4 }
 0x3d7   : > { %v2400_v60 = vadd.f32 %v2399_v52, %v2398_v8  ;;  %v2408_v63 = vrot.slane %v2407_v48, 1  ;;  %v2416_v4 = vadd.f32 %v2415_v2, %v2414_v38  ;;  %v2424_v46 = vrot.slane %v2423_v17, 2 }
 0x3d8   : > { %v2576_v15 = vadd.f32 %v2575_v45, %v5105_v49  ;;  %v2581_v21 = vsel %vm1884_vm3, %v5081_v40, 0.0  ;;  %v2582_v27 = vsel %vm1884_vm3, %v5085_v23, 0.0  ;;  %v2590_v37 = vsel %vm1884_vm3, %v5091_v0, 0.0 }
 0x3d9   : > { %v2409_v25 = vadd.f32 %v2408_v63, %v2407_v48  ;;  %v2417_v54 = vrot.slane %v2416_v4, 1  ;;  %v2425_v35 = vadd.f32 %v2424_v46, %v2423_v17  ;;  %v2519_v29 = vsel %vm2051_vm7, %v2400_v60, %v2518_v18 }
 0x3da   : > { %v2577_v6 = vrot.slane %v2576_v15, 2  ;;  %v2583_v41 = vadd.f32 %v2582_v27, %v2581_v21  ;;  %v2591_v24 = vsel %vm1884_vm3, %v5094_v12, 0.0  ;;  %v2599_v49 = vsel %vm1884_vm3, %v5100_v44, 0.0 }
 0x3db   : > { %v2418_v40 = vadd.f32 %v2417_v54, %v2416_v4  ;;  %v2426_v36 = vrot.slane %v2425_v35, 1  ;;  %v2520_v23 = vsel %vm2053_vm8, %v2409_v25, %v2519_v29  ;;  %v2592_v31 = vadd.f32 %v2591_v24, %v2590_v37 }
 0x3dc   : > { %v2578_v55 = vadd.f32 %v2577_v6, %v2576_v15  ;;  %v2584_v0 = vrot.slane %v2583_v41, 4  ;;  %v2600_v5 = vsel %vm1884_vm3, %v5103_v10, 0.0  ;;  %v2608_v59 = vsel %vm1884_vm3, %v5110_v61, 0.0 }
 0x3dd   : > { %v2427_v43 = vadd.f32 %v2426_v36, %v2425_v35  ;;  %v2521_v34 = vsel %vm2055_vm9, %v2418_v40, %v2520_v23  ;;  %v2593_v12 = vrot.slane %v2592_v31, 4  ;;  %v2601_v8 = vadd.f32 %v2600_v5, %v2599_v49 }
 0x3de   : > { %v2579_v19 = vrot.slane %v2578_v55, 1  ;;  %v2585_v44 = vadd.f32 %v2584_v0, %v2583_v41  ;;  %v2609_v38 = vsel %vm1884_vm3, %v5113_v13, 0.0  ;;  %v2617_v42 = vsel %vm1884_vm3, %v5118_v3, 0.0 }
 0x3df   : > { %v2522_v26 = vsel %vm2057_vm10, %v2427_v43, %v2521_v34  ;;  %v2594_v51 = vadd.f32 %v2593_v12, %v2592_v31  ;;  %v2602_v10 = vrot.slane %v2601_v8, 4  ;;  %v2610_v52 = vadd.f32 %v2609_v38, %v2608_v59 }
 0x3e0   : > { %v2532_v61 = vadd.f32 %v2522_v26, %v5064_v22  ;;  %v2580_v48 = vadd.f32 %v2579_v19, %v2578_v55  ;;  %v2586_v2 = vrot.slane %v2585_v44, 2  ;;  %v2618_v17 = vsel %vm1884_vm3, %v2551_v32, 0.0 }
 0x3e1   : > { %v2595_v18 = vrot.slane %v2594_v51, 2  ;;  %v2603_v45 = vadd.f32 %v2602_v10, %v2601_v8  ;;  %v2611_v60 = vrot.slane %v2610_v52, 4  ;;  %v2619_v63 = vadd.f32 %v2618_v17, %v2617_v42 }
 0x3e2   : > { %2534 = vst.msk [vmem:[#allocation3] sm:$0xff] %vm1884_vm3, %v2532_v61  ;;  %v2587_v13 = vadd.f32 %v2586_v2, %v2585_v44  ;;  %v2626_v3 = vsel %vm1884_vm3, %v2552_v57, 0.0  ;;  %v2627_v4 = vsel %vm1884_vm3, %v2553_v9, 0.0  ;;  %v2635_v46 = vsel %vm1884_vm3, %v2554_v30, 0.0 }
 0x3e3   : > { %v2596_v15 = vadd.f32 %v2595_v18, %v2594_v51  ;;  %v2604_v21 = vrot.slane %v2603_v45, 2  ;;  %v2612_v22 = vadd.f32 %v2611_v60, %v2610_v52  ;;  %v2620_v27 = vrot.slane %v2619_v63, 4 }
 0x3e4   : > { %v2588_v37 = vrot.slane %v2587_v13, 1  ;;  %v2628_v25 = vadd.f32 %v2627_v4, %v2626_v3  ;;  %v2636_v32 = vsel %vm1884_vm3, %v2555_v53, 0.0  ;;  %v2061_v54 = vsel %vm2049_vm6, %v5074_v58, %v5042_v33 }
 0x3e5   : > { %v2597_v35 = vrot.slane %v2596_v15, 1  ;;  %v2605_v29 = vadd.f32 %v2604_v21, %v2603_v45  ;;  %v2613_v6 = vrot.slane %v2612_v22, 2  ;;  %v2621_v57 = vadd.f32 %v2620_v27, %v2619_v63 }
 0x3e6   : > { %v2589_v41 = vadd.f32 %v2588_v37, %v2587_v13  ;;  %v2629_v9 = vrot.slane %v2628_v25, 4  ;;  %v2637_v24 = vadd.f32 %v2636_v32, %v2635_v46  ;;  %v5577_v30 = vrot.slane %v5066_v7, 2 }
 0x3e7   : > { %v2598_v40 = vadd.f32 %v2597_v35, %v2596_v15  ;;  %v2606_v36 = vrot.slane %v2605_v29, 1  ;;  %v2614_v23 = vadd.f32 %v2613_v6, %v2612_v22  ;;  %v2622_v31 = vrot.slane %v2621_v57, 2 }
 0x3e8   : > { %v1999_v49 = vmax.f32 %v5066_v7, %v5577_v30  ;;  %v2630_v53 = vadd.f32 %v2629_v9, %v2628_v25  ;;  %v2638_v55 = vrot.slane %v2637_v24, 4  ;;  %v2732_v0 = vsel %vm2045_vm4, %v2589_v41, %v2580_v48 }
 0x3e9   : > { %v2607_v58 = vadd.f32 %v2606_v36, %v2605_v29  ;;  %v2615_v5 = vrot.slane %v2614_v23, 1  ;;  %v2623_v59 = vadd.f32 %v2622_v31, %v2621_v57  ;;  %v2733_v43 = vsel %vm2047_vm5, %v2598_v40, %v2732_v0 }
 0x3ea   : > { %v2000_v33 = vrot.slane %v1999_v49, 1  ;;  %v2631_v34 = vrot.slane %v2630_v53, 2  ;;  %v2639_v12 = vadd.f32 %v2638_v55, %v2637_v24  ;;  %v5578_v19 = vrot.slane %v5055_v50, 4  ;;  %v1883_v24 = vld [vmem:[#allocation2 + $0x8] sm:$0xff] }
 0x3eb   : > { %v2616_v44 = vadd.f32 %v2615_v5, %v2614_v23  ;;  %v2624_v38 = vrot.slane %v2623_v59, 1  ;;  %v2734_v42 = vsel %vm2049_vm6, %v2607_v58, %v2733_v43  ;;  %v5579_v26 = vrot.slane %v5057_v47, 4 }
 0x3ec   : > { %v2001_v8 = vmax.f32 %v1999_v49, %v2000_v33  ;;  %v2006_v7 = vmax.f32 %v5055_v50, %v5578_v19  ;;  %v2632_v10 = vadd.f32 %v2631_v34, %v2630_v53  ;;  %v2640_v52 = vrot.slane %v2639_v12, 2 }
 0x3ed   : > { %v2015_v51 = vmax.f32 %v5057_v47, %v5579_v26  ;;  %v2625_v2 = vadd.f32 %v2624_v38, %v2623_v59  ;;  %v2735_v17 = vsel %vm2051_vm7, %v2616_v44, %v2734_v42  ;;  %v2023_v45 = vrot.slane %v5070_v62, 4  ;;  %v2536_v47 = vld [vmem:[#allocation4] sm:$0xff] }
 0x3ee   : > { %v2062_v61 = vsel %vm2051_vm7, %v2001_v8, %v2061_v54  ;;  %v2007_v48 = vrot.slane %v2006_v7, 2  ;;  %v2633_v50 = vrot.slane %v2632_v10, 1  ;;  %v2641_v60 = vadd.f32 %v2640_v52, %v2639_v12 }
 0x3ef   : > { %v2016_v18 = vrot.slane %v2015_v51, 2  ;;  %v2736_v13 = vsel %vm2053_vm8, %v2625_v2, %v2735_v17  ;;  %v2024_v4 = vmax.f32 %v5070_v62, %v2023_v45  ;;  %v2538_v54 = vmul.f32 %v5037_v28, %v2536_v47  ;;  %v5581_v2 = vld [vmem:[#allocation62_spill] sm:$0xff] }
 0x3f0   : > { %v2008_v63 = vmax.f32 %v2006_v7, %v2007_v48  ;;  %v2634_v46 = vadd.f32 %v2633_v50, %v2632_v10  ;;  %v2642_v15 = vrot.slane %v2641_v60, 1 }
 0x3f1   : > { %v2017_v3 = vmax.f32 %v2015_v51, %v2016_v18  ;;  %v2025_v27 = vrot.slane %v2024_v4, 2  ;;  %v5582_v18 = vld [vmem:[#allocation61_spill] sm:$0xff] }
 0x3f2   : > { %v2009_v21 = vrot.slane %v2008_v63, 1  ;;  %v2643_v37 = vadd.f32 %v2642_v15, %v2641_v60  ;;  %v2737_v25 = vsel %vm2055_vm9, %v2634_v46, %v2736_v13  ;;  %v5586_v46 = vld [vmem:[#allocation66_spill] sm:$0xff]  ;;  %v5587_v15 = vld [vmem:[#allocation68_spill] sm:$0xff] }
 0x3f3   : > { %v2018_v22 = vrot.slane %v2017_v3, 1  ;;  %v2026_v29 = vmax.f32 %v2024_v4, %v2025_v27 }
 0x3f4   : > { %v2010_v32 = vmax.f32 %v2008_v63, %v2009_v21  ;;  %v2738_v6 = vsel %vm2057_vm10, %v2643_v37, %v2737_v25  ;;  %v5589_v37 = vld [vmem:[#allocation70_spill] sm:$0xff] }
 0x3f5   : > { %v2019_v35 = vmax.f32 %v2017_v3, %v2018_v22  ;;  %v2748_v41 = vadd.f32 %v2738_v6, %v2538_v54  ;;  %v2027_v9 = vrot.slane %v2026_v29, 1  ;;  %v5585_v3 = vld [vmem:[#allocation65_spill] sm:$0xff]  ;;  %v5588_v22 = vld [vmem:[#allocation67_spill] sm:$0xff] }
 0x3f6   : > { %v2063_v57 = vsel %vm2053_vm8, %v2010_v32, %v2062_v61  ;;  %v5580_v61 = vld [vmem:[#allocation60_spill] sm:$0xff]  ;;  %v5590_v32 = vld [vmem:[#allocation69_spill] sm:$0xff] }
 0x3f7   : > { %v2064_v62 = vsel %vm2055_vm9, %v2019_v35, %v2063_v57  ;;  %2750 = vst.msk [vmem:[#allocation4] sm:$0xff] %vm1884_vm3, %v2748_v41  ;;  %v2028_v30 = vmax.f32 %v2026_v29, %v2027_v9 }
 0x3f9   : > { %v2065_v49 = vsel %vm2057_vm10, %v2028_v30, %v2064_v62 }
 0x3fa   : > { %v2069_v40 = vmax.f32 %v1883_v24, %v2065_v49 }
 0x3fc   : > { %v2127_v36 = vcombine.high %v2069_v40, %v2069_v40  ;;  %v2134_v28 = vrot.slane %v2069_v40, %v4465_v11  ;;  %2753 = vst.msk [vmem:[#allocation2 + $0x8] sm:$0xff] %vm1884_vm3, %v2069_v40  ;;  %v2071_v23 = vsub.f32 %v1883_v24, %v2069_v40 }
 0x3fe   : > { %v2141_v31 = vrot.slane %v2127_v36, %v4465_v11  ;;  %v2142_v53 = vcombine.high %v2134_v28, %v2134_v28  ;;  %v2150_v55 = vrot.slane %v2134_v28, %v4465_v11  ;;  %v2074_v5 = vmul.f32 1.442695, %v2071_v23 }
 0x400   : > { %v2143_v0 = vcombine.high %v2141_v31, %v2141_v31  ;;  %v2157_v33 = vrot.slane %v2141_v31, %v4465_v11  ;;  %v2164_v58 = vrot.slane %v2142_v53, %v4465_v11  ;;  %v2172_v59 = vcombine.high %v2150_v55, %v2150_v55 }
 0x401   : > { %v2211_v43 = vrot.slane %v2150_v55, %v4468_v14  ;;  %3527 = vpow2.f32 %v2074_v5 }
 0x402   : > { %v2171_v34 = vrot.slane %v2143_v0, %v4465_v11  ;;  %v2173_v12 = vcombine.high %v2157_v33, %v2157_v33  ;;  %v2174_v8 = vcombine.high %v2164_v58, %v2164_v58  ;;  %v2215_v19 = vrot.slane %v2164_v58, %v4468_v14  ;;  %v5591_v0 = vld [vmem:[#allocation45_spill] sm:$0xff] }
 0x403   : > { %v2219_v7 = vrot.slane %v2172_v59, %v4468_v14  ;;  %v2227_v44 = vrot.slane %v2157_v33, %v4468_v14  ;;  %v2272_v38 = vsub.f32 %v4886_v1, %v2211_v43  ;;  %v2273_v42 = vsub.f32 %v4883_v56, %v2211_v43  ;;  %v5583_v1 = vld [vmem:[#allocation64_spill] sm:$0xff]  ;;  %v5584_v56 = vld [vmem:[#allocation63_spill] sm:$0xff] }
 0x404   : > { %v2175_v26 = vcombine.high %v2171_v34, %v2171_v34  ;;  %v2223_v51 = vrot.slane %v2174_v8, %v4468_v14  ;;  %v2231_v10 = vrot.slane %v2171_v34, %v4468_v14  ;;  %v2235_v52 = vrot.slane %v2173_v12, %v4468_v14  ;;  %v5592_v59 = vld [vmem:[#allocation44_spill] sm:$0xff] }
 0x405   : > { %v2274_v11 = vsub.f32 %v4903_v39, %v2215_v19  ;;  %v2275_v48 = vsub.f32 %v5580_v61, %v2215_v19  ;;  %v2276_v17 = vsub.f32 %v5581_v2, %v2219_v7  ;;  %v2277_v45 = vsub.f32 %v5582_v18, %v2219_v7  ;;  %v5593_v19 = vld [vmem:[#allocation47_spill] sm:$0xff] }
 0x406   : > { %v2239_v50 = vrot.slane %v2175_v26, %v4468_v14  ;;  %v2278_v60 = vsub.f32 %v5583_v1, %v2223_v51  ;;  %v2279_v63 = vsub.f32 %v5584_v56, %v2223_v51  ;;  %v2280_v13 = vsub.f32 %v4989_v20, %v2227_v44 }
 0x407   : > { %v2281_v4 = vsub.f32 %v5585_v3, %v2227_v44  ;;  %v2282_v47 = vsub.f32 %v5004_v16, %v2231_v10  ;;  %v2283_v39 = vsub.f32 %v5586_v46, %v2231_v10  ;;  %v2284_v21 = vsub.f32 %v5587_v15, %v2235_v52  ;;  %v5597_v46 = vld [vmem:[#allocation51_spill] sm:$0xff]  ;;  %v5598_v15 = vld [vmem:[#allocation50_spill] sm:$0xff] }
 0x408   : > { %v2285_v27 = vsub.f32 %v5588_v22, %v2235_v52  ;;  %v2286_v25 = vsub.f32 %v5589_v37, %v2239_v50  ;;  %v2287_v14 = vsub.f32 %v5590_v32, %v2239_v50  ;;  %v2320_v54 = vmul.f32 1.442695, %v2272_v38 }
 0x409   : > { %v2322_v35 = vmul.f32 1.442695, %v2273_v42  ;;  %v2324_v29 = vmul.f32 1.442695, %v2274_v11  ;;  %v2326_v6 = vmul.f32 1.442695, %v2275_v48 }
 0x40a   : > { %3529 = vpow2.f32 %v2320_v54  ;;  %v2328_v20 = vmul.f32 1.442695, %v2276_v17  ;;  %v2330_v57 = vmul.f32 1.442695, %v2277_v45  ;;  %v2332_v16 = vmul.f32 1.442695, %v2278_v60 }
 0x40b   : > { %3531 = vpow2.f32 %v2322_v35  ;;  %v2334_v41 = vmul.f32 1.442695, %v2279_v63  ;;  %v2336_v62 = vmul.f32 1.442695, %v2280_v13  ;;  %v2338_v9 = vmul.f32 1.442695, %v2281_v4  ;;  %v5221_v40 = vpop.eup %3527 }
 0x40c   : > { %3533 = vpow2.f32 %v2324_v29  ;;  %v2340_v24 = vmul.f32 1.442695, %v2282_v47  ;;  %v2342_v30 = vmul.f32 1.442695, %v2283_v39  ;;  %v2344_v49 = vmul.f32 1.442695, %v2284_v21 }
 0x40d   : > { %3535 = vpow2.f32 %v2326_v6  ;;  %v2346_v36 = vmul.f32 1.442695, %v2285_v27  ;;  %v2348_v23 = vmul.f32 1.442695, %v2286_v25  ;;  %v2350_v53 = vmul.f32 1.442695, %v2287_v14 }
 0x40e   : > { %3537 = vpow2.f32 %v2328_v20  ;;  %v5594_v42 = vld [vmem:[#allocation46_spill] sm:$0xff]  ;;  %v5595_v17 = vld [vmem:[#allocation49_spill] sm:$0xff]  ;;  %v5596_v45 = vld [vmem:[#allocation48_spill] sm:$0xff] }
 0x40f   : > { %3539 = vpow2.f32 %v2330_v57  ;;  %v5599_v6 = vld [vmem:[#allocation53_spill] sm:$0xff]  ;;  %v5600_v57 = vld [vmem:[#allocation52_spill] sm:$0xff] }
 0x410   : > { %3541 = vpow2.f32 %v2332_v16 }
 0x411   : > { %3543 = vpow2.f32 %v2334_v41 }
 0x412   : > { %3545 = vpow2.f32 %v2336_v62 }
 0x413   : > { %3547 = vpow2.f32 %v2338_v9 }
 0x414   : > { %v3530_v28 = vpop.eup %3529  ;;  %3549 = vpow2.f32 %v2340_v24 }
 0x415   : > { %v3532_v31 = vpop.eup %3531  ;;  %3551 = vpow2.f32 %v2342_v30  ;;  %v2428_v55 = vsel %vm1884_vm3, %v3530_v28, 0.0  ;;  %v2556_v33 = vmul.f32 %v3530_v28, %v5591_v0 }
 0x416   : > { %v3534_v58 = vpop.eup %3533  ;;  %3553 = vpow2.f32 %v2344_v49  ;;  %v2429_v5 = vsel %vm1884_vm3, %v3532_v31, 0.0  ;;  %v2557_v43 = vmul.f32 %v3532_v31, %v5592_v59  ;;  %v5601_v31 = vld [vmem:[#allocation55_spill] sm:$0xff] }
 0x417   : > { %v3536_v34 = vpop.eup %3535  ;;  %3555 = vpow2.f32 %v2346_v36  ;;  %v2430_v12 = vadd.f32 %v2429_v5, %v2428_v55  ;;  %v2437_v8 = vsel %vm1884_vm3, %v3534_v58, 0.0  ;;  %v5229_v7 = vmul.f32 %v3534_v58, %v5593_v19 }
 0x418   : > { %v3538_v44 = vpop.eup %3537  ;;  %3557 = vpow2.f32 %v2348_v23  ;;  %v2438_v38 = vsel %vm1884_vm3, %v3536_v34, 0.0  ;;  %v5233_v26 = vmul.f32 %v3536_v34, %v5594_v42  ;;  %v2644_v51 = vsel %vm1884_vm3, %v2556_v33, 0.0 }
 0x419   : > { %v3540_v10 = vpop.eup %3539  ;;  %3559 = vpow2.f32 %v2350_v53  ;;  %v2431_v52 = vrot.slane %v2430_v12, 4  ;;  %v2439_v11 = vadd.f32 %v2438_v38, %v2437_v8  ;;  %v2446_v61 = vsel %vm1884_vm3, %v3538_v44, 0.0 }
 0x41a   : > { %v3542_v48 = vpop.eup %3541  ;;  %v2447_v2 = vsel %vm1884_vm3, %v3540_v10, 0.0  ;;  %v5239_v18 = vmul.f32 %v3538_v44, %v5595_v17  ;;  %v5242_v50 = vmul.f32 %v3540_v10, %v5596_v45  ;;  %v2645_v1 = vsel %vm1884_vm3, %v2557_v43, 0.0 }
 0x41b   : > { %v3544_v60 = vpop.eup %3543  ;;  %v2432_v56 = vadd.f32 %v2431_v52, %v2430_v12  ;;  %v2440_v63 = vrot.slane %v2439_v11, 4  ;;  %v2448_v13 = vadd.f32 %v2447_v2, %v2446_v61  ;;  %v2455_v3 = vsel %vm1884_vm3, %v3542_v48, 0.0 }
 0x41c   : > { %v3546_v4 = vpop.eup %3545  ;;  %v2456_v47 = vsel %vm1884_vm3, %v3544_v60, 0.0  ;;  %v5248_v39 = vmul.f32 %v3542_v48, %v5597_v46  ;;  %v5251_v21 = vmul.f32 %v3544_v60, %v5598_v15  ;;  %v5253_v22 = vadd.f32 %v2645_v1, %v2644_v51 }
 0x41d   : > { %v3548_v27 = vpop.eup %3547  ;;  %v2433_v37 = vrot.slane %v2432_v56, 2  ;;  %v2441_v25 = vadd.f32 %v2440_v63, %v2439_v11  ;;  %v2449_v32 = vrot.slane %v2448_v13, 4  ;;  %v2457_v14 = vadd.f32 %v2456_v47, %v2455_v3  ;;  %v5602_v47 = vld [vmem:[#allocation54_spill] sm:$0xff] }
 0x41e   : > { %v3550_v54 = vpop.eup %3549  ;;  %v2464_v35 = vsel %vm1884_vm3, %v3546_v4, 0.0  ;;  %v2465_v29 = vsel %vm1884_vm3, %v3548_v27, 0.0  ;;  %v5258_v20 = vmul.f32 %v3546_v4, %v5599_v6  ;;  %v5261_v16 = vmul.f32 %v3548_v27, %v5600_v57 }
 0x41f   : > { %v3552_v41 = vpop.eup %3551  ;;  %v2434_v62 = vadd.f32 %v2433_v37, %v2432_v56  ;;  %v2442_v9 = vrot.slane %v2441_v25, 2  ;;  %v2450_v24 = vadd.f32 %v2449_v32, %v2448_v13  ;;  %v2458_v30 = vrot.slane %v2457_v14, 4 }
 0x420   : > { %v3554_v49 = vpop.eup %3553  ;;  %v2466_v36 = vadd.f32 %v2465_v29, %v2464_v35  ;;  %v2473_v28 = vsel %vm1884_vm3, %v3550_v54, 0.0  ;;  %v2474_v23 = vsel %vm1884_vm3, %v3552_v41, 0.0  ;;  %v5266_v53 = vmul.f32 %v3550_v54, %v5601_v31  ;;  %v5603_v54 = vld [vmem:[#allocation57_spill] sm:$0xff]  ;;  %v5604_v29 = vld [vmem:[#allocation56_spill] sm:$0xff] }
 0x421   : > { %v3556_v55 = vpop.eup %3555  ;;  %v2435_v0 = vrot.slane %v2434_v62, 1  ;;  %v2443_v33 = vadd.f32 %v2442_v9, %v2441_v25  ;;  %v2451_v58 = vrot.slane %v2450_v24, 2  ;;  %v2459_v5 = vadd.f32 %v2458_v30, %v2457_v14 }
 0x422   : > { %v3558_v59 = vpop.eup %3557  ;;  %v2467_v43 = vrot.slane %v2466_v36, 4  ;;  %v2475_v34 = vadd.f32 %v2474_v23, %v2473_v28  ;;  %v2482_v12 = vsel %vm1884_vm3, %v3554_v49, 0.0  ;;  %v2483_v8 = vsel %vm1884_vm3, %v3556_v55, 0.0 }
 0x423   : > { %v3560_v19 = vpop.eup %3559  ;;  %v2436_v44 = vadd.f32 %v2435_v0, %v2434_v62  ;;  %v2444_v38 = vrot.slane %v2443_v33, 1  ;;  %v2452_v42 = vadd.f32 %v2451_v58, %v2450_v24  ;;  %v2460_v51 = vrot.slane %v2459_v5, 2 }
 0x424   : > { %v2468_v10 = vadd.f32 %v2467_v43, %v2466_v36  ;;  %v2476_v52 = vrot.slane %v2475_v34, 4  ;;  %v2484_v11 = vadd.f32 %v2483_v8, %v2482_v12  ;;  %v2491_v61 = vsel %vm1884_vm3, %v3558_v59, 0.0  ;;  %v5605_v36 = vld [vmem:[#allocation59_spill] sm:$0xff] }
 0x425   : > { %v2445_v48 = vadd.f32 %v2444_v38, %v2443_v33  ;;  %v2453_v2 = vrot.slane %v2452_v42, 1  ;;  %v2461_v17 = vadd.f32 %v2460_v51, %v2459_v5  ;;  %v2492_v45 = vsel %vm1884_vm3, %v3560_v19, 0.0 }
 0x426   : > { %v2469_v1 = vrot.slane %v2468_v10, 2  ;;  %v2477_v60 = vadd.f32 %v2476_v52, %v2475_v34  ;;  %v2485_v56 = vrot.slane %v2484_v11, 4  ;;  %v2493_v63 = vadd.f32 %v2492_v45, %v2491_v61 }
 0x427   : > { %v2454_v13 = vadd.f32 %v2453_v2, %v2452_v42  ;;  %v2462_v3 = vrot.slane %v2461_v17, 1  ;;  %v2523_v4 = vsel %vm2045_vm4, %v2445_v48, %v2436_v44  ;;  %v2567_v46 = vmul.f32 %v3552_v41, %v5602_v47  ;;  %v5606_v41 = vld [vmem:[#allocation58_spill] sm:$0xff] }
 0x428   : > { %v2470_v15 = vadd.f32 %v2469_v1, %v2468_v10  ;;  %v2478_v27 = vrot.slane %v2477_v60, 2  ;;  %v2486_v37 = vadd.f32 %v2485_v56, %v2484_v11  ;;  %v2494_v25 = vrot.slane %v2493_v63, 4 }
 0x429   : > { %v2463_v32 = vadd.f32 %v2462_v3, %v2461_v17  ;;  %v2524_v14 = vsel %vm2047_vm5, %v2454_v13, %v2523_v4  ;;  %v2568_v35 = vmul.f32 %v3554_v49, %v5603_v54  ;;  %v2569_v6 = vmul.f32 %v3556_v55, %v5604_v29 }
 0x42a   : > { %v2471_v57 = vrot.slane %v2470_v15, 1  ;;  %v2479_v62 = vadd.f32 %v2478_v27, %v2477_v60  ;;  %v2487_v9 = vrot.slane %v2486_v37, 2  ;;  %v2495_v24 = vadd.f32 %v2494_v25, %v2493_v63 }
 0x42b   : > { %v2525_v30 = vsel %vm2049_vm6, %v2463_v32, %v2524_v14  ;;  %v2570_v28 = vmul.f32 %v3558_v59, %v5605_v36  ;;  %v2571_v23 = vmul.f32 %v3560_v19, %v5606_v41  ;;  %v2647_v31 = vrot.slane %v5253_v22, 4 }
 0x42c   : > { %v2472_v0 = vadd.f32 %v2471_v57, %v2470_v15  ;;  %v2480_v33 = vrot.slane %v2479_v62, 1  ;;  %v2488_v58 = vadd.f32 %v2487_v9, %v2486_v37  ;;  %v2496_v5 = vrot.slane %v2495_v24, 2 }
 0x42d   : > { %v2648_v49 = vadd.f32 %v2647_v31, %v5253_v22  ;;  %v2653_v55 = vsel %vm1884_vm3, %v5229_v7, 0.0  ;;  %v2654_v43 = vsel %vm1884_vm3, %v5233_v26, 0.0  ;;  %v2662_v34 = vsel %vm1884_vm3, %v5239_v18, 0.0  ;;  %v2353_v7 = vld [vmem:[#allocation3 + $0x8] sm:$0xff] }
 0x42e   : > { %v2481_v59 = vadd.f32 %v2480_v33, %v2479_v62  ;;  %v2489_v12 = vrot.slane %v2488_v58, 1  ;;  %v2497_v8 = vadd.f32 %v2496_v5, %v2495_v24  ;;  %v2526_v19 = vsel %vm2051_vm7, %v2472_v0, %v2525_v30 }
 0x42f   : > { %v2649_v44 = vrot.slane %v2648_v49, 2  ;;  %v2655_v38 = vadd.f32 %v2654_v43, %v2653_v55  ;;  %v2663_v42 = vsel %vm1884_vm3, %v5242_v50, 0.0  ;;  %v2671_v22 = vsel %vm1884_vm3, %v5248_v39, 0.0 }
 0x430   : > { %v2490_v51 = vadd.f32 %v2489_v12, %v2488_v58  ;;  %v2498_v10 = vrot.slane %v2497_v8, 1  ;;  %v2527_v26 = vsel %vm2053_vm8, %v2481_v59, %v2526_v19  ;;  %v2664_v52 = vadd.f32 %v2663_v42, %v2662_v34 }
 0x431   : > { %v2650_v18 = vadd.f32 %v2649_v44, %v2648_v49  ;;  %v2656_v11 = vrot.slane %v2655_v38, 4  ;;  %v2672_v61 = vsel %vm1884_vm3, %v5251_v21, 0.0  ;;  %v2680_v48 = vsel %vm1884_vm3, %v5258_v20, 0.0 }
 0x432   : > { %v2499_v2 = vadd.f32 %v2498_v10, %v2497_v8  ;;  %v2528_v50 = vsel %vm2055_vm9, %v2490_v51, %v2527_v26  ;;  %v2665_v17 = vrot.slane %v2664_v52, 4  ;;  %v2673_v45 = vadd.f32 %v2672_v61, %v2671_v22 }
 0x433   : > { %v2355_v39 = vmul.f32 %v5221_v40, %v2353_v7  ;;  %v2657_v1 = vadd.f32 %v2656_v11, %v2655_v38  ;;  %v2681_v60 = vsel %vm1884_vm3, %v5261_v16, 0.0  ;;  %v2689_v56 = vsel %vm1884_vm3, %v5266_v53, 0.0 }
 0x434   : > { %v2529_v63 = vsel %vm2057_vm10, %v2499_v2, %v2528_v50  ;;  %v2666_v21 = vadd.f32 %v2665_v17, %v2664_v52  ;;  %v2674_v13 = vrot.slane %v2673_v45, 4  ;;  %v2682_v3 = vadd.f32 %v2681_v60, %v2680_v48  ;;  %v2537_v48 = vld [vmem:[#allocation4 + $0x8] sm:$0xff] }
 0x435   : > { %v2533_v20 = vadd.f32 %v2529_v63, %v2355_v39  ;;  %v2651_v4 = vrot.slane %v2650_v18, 1  ;;  %v2658_v47 = vrot.slane %v2657_v1, 2  ;;  %v2690_v15 = vsel %vm1884_vm3, %v2567_v46, 0.0 }
 0x436   : > { %v2667_v27 = vrot.slane %v2666_v21, 2  ;;  %v2675_v37 = vadd.f32 %v2674_v13, %v2673_v45  ;;  %v2683_v25 = vrot.slane %v2682_v3, 4  ;;  %v2691_v32 = vadd.f32 %v2690_v15, %v2689_v56  ;;  %v2758_v56 = vld [vmem:[#allocation3] sm:$0xff] (!%p3097_p7) }
 0x437   : > { %2535 = vst.msk [vmem:[#allocation3 + $0x8] sm:$0xff] %vm1884_vm3, %v2533_v20  ;;  %v2659_v16 = vadd.f32 %v2658_v47, %v2657_v1  ;;  %v2698_v14 = vsel %vm1884_vm3, %v2568_v35, 0.0  ;;  %v2699_v53 = vsel %vm1884_vm3, %v2569_v6, 0.0  ;;  %v2707_v54 = vsel %vm1884_vm3, %v2570_v28, 0.0 }
 0x438   : > { %v2668_v29 = vadd.f32 %v2667_v27, %v2666_v21  ;;  %v2676_v57 = vrot.slane %v2675_v37, 2  ;;  %v2684_v62 = vadd.f32 %v2683_v25, %v2682_v3  ;;  %v2692_v9 = vrot.slane %v2691_v32, 4  ;;  %v2762_v21 = vld [vmem:[#allocation4] sm:$0xff] (!%p3097_p7) }
 0x439   : > { %v2660_v24 = vrot.slane %v2659_v16, 1  ;;  %v2700_v30 = vadd.f32 %v2699_v53, %v2698_v14  ;;  %v2708_v46 = vsel %vm1884_vm3, %v2571_v23, 0.0  ;;  %v2652_v33 = vadd.f32 %v2651_v4, %v2650_v18 }
 0x43a   : > { %v2669_v36 = vrot.slane %v2668_v29, 1  ;;  %v2677_v41 = vadd.f32 %v2676_v57, %v2675_v37  ;;  %v2685_v31 = vrot.slane %v2684_v62, 2  ;;  %v2693_v0 = vadd.f32 %v2692_v9, %v2691_v32 }
 0x43b   : > { %v2661_v58 = vadd.f32 %v2660_v24, %v2659_v16  ;;  %v2701_v5 = vrot.slane %v2700_v30, 4  ;;  %v2709_v35 = vadd.f32 %v2708_v46, %v2707_v54  ;;  %v2539_v39 = vmul.f32 %v5221_v40, %v2537_v48 }
 0x43c   : > { %v2670_v49 = vadd.f32 %v2669_v36, %v2668_v29  ;;  %v2678_v6 = vrot.slane %v2677_v41, 1  ;;  %v2686_v55 = vadd.f32 %v2685_v31, %v2684_v62  ;;  %v2694_v28 = vrot.slane %v2693_v0, 2 }
 0x43d   : > { %v2702_v43 = vadd.f32 %v2701_v5, %v2700_v30  ;;  %v2710_v34 = vrot.slane %v2709_v35, 4  ;;  %v2739_v59 = vsel %vm2045_vm4, %v2661_v58, %v2652_v33  ;;  %3561 = vrcp.f32 (!%p3097_p7), %v2758_v56 }
 0x43e   : > { %v2679_v12 = vadd.f32 %v2678_v6, %v2677_v41  ;;  %v2687_v8 = vrot.slane %v2686_v55, 1  ;;  %v2695_v19 = vadd.f32 %v2694_v28, %v2693_v0  ;;  %v2740_v23 = vsel %vm2047_vm5, %v2670_v49, %v2739_v59  ;;  %v2759_v63 = vld [vmem:[#allocation3 + $0x8] sm:$0xff] (!%p3097_p7) }
 0x43f   : > { %v2703_v44 = vrot.slane %v2702_v43, 2  ;;  %v2711_v38 = vadd.f32 %v2710_v34, %v2709_v35  ;;  %3563 = vrcp.f32 (!%p3097_p7), %v2759_v63 }
 0x440   : > { %v2688_v42 = vadd.f32 %v2687_v8, %v2686_v55  ;;  %v2696_v22 = vrot.slane %v2695_v19, 1  ;;  %v2741_v7 = vsel %vm2049_vm6, %v2679_v12, %v2740_v23 }
 0x441   : > { %v2704_v51 = vadd.f32 %v2703_v44, %v2702_v43  ;;  %v2712_v10 = vrot.slane %v2711_v38, 2 }
 0x442   : > { %v2697_v26 = vadd.f32 %v2696_v22, %v2695_v19  ;;  %v2742_v52 = vsel %vm2051_vm7, %v2688_v42, %v2741_v7 }
 0x443   : > { %v2705_v18 = vrot.slane %v2704_v51, 1  ;;  %v2713_v11 = vadd.f32 %v2712_v10, %v2711_v38 }
 0x444   : > { %v2743_v61 = vsel %vm2053_vm8, %v2697_v26, %v2742_v52 }
 0x445   : > { %v2706_v2 = vadd.f32 %v2705_v18, %v2704_v51  ;;  %v2714_v50 = vrot.slane %v2713_v11, 1 }
 0x446   : > { %2757 = sbr.rel (%p3097_p7) target bundleno = 1111 (0x457), region = 84 }
 0x447   : > { %v2715_v17 = vadd.f32 %v2714_v50, %v2713_v11  ;;  %v2744_v45 = vsel %vm2055_vm9, %v2706_v2, %v2743_v61  ;;  %v3562_v3 = vpop.eup (!%p3097_p7), %3561 }
 0x448   : > { %v2764_v4 = vmul.f32 (!%p3097_p7), %v3562_v3, %v2762_v21 }
 0x449   : > { %v2745_v1 = vsel %vm2057_vm10, %v2715_v17, %v2744_v45  ;;  %v3564_v20 = vpop.eup (!%p3097_p7), %3563 }
 0x44a   : > { %v2749_v60 = vadd.f32 %v2745_v1, %v2539_v39  ;;  %2766 = vst.msk [vmem:[%s4460_s27] sm:$0xff] (!%p3097_p7), %vm1884_vm3, %v2764_v4 }
 0x44c   : > { %2751 = vst.msk [vmem:[#allocation4 + $0x8] sm:$0xff] %vm1884_vm3, %v2749_v60 }
 0x453   : > { %v2763_v13 = vld [vmem:[#allocation4 + $0x8] sm:$0xff] }
 0x454   : > { %v2765_v40 = vmul.f32 %v3564_v20, %v2763_v13 }
 0x456   : > { %2767 = vst.msk [vmem:[%s4460_s27 + $0x8] sm:$0xff] %vm1884_vm3, %v2765_v40 }
 0x457 PF: > { %s5608_s18 = sld [smem:[#allocation28_spill]]  ;;  %s5609_s30 = sld [smem:[#allocation29_spill]] }
 0x458   : > { %s5610_s4 = sld [smem:[#allocation39_spill]]  ;;  %s2784_s7 = sshll.u32 %s4460_s27, 4  ;;  %s5328_s7 = int_to_ptr.vmem [resolvable:$true] %s2784_s7 }
 0x459   : > { %s5611_s23 = sld [smem:[#allocation75_spill]]  ;;  %s2769_s11 = scalar_lea.sflag [#allocation7], %s4424_s13 }
 0x45a   : > { %s3771_s8 = scalar_lea.vmem %s5328_s7, 256  ;;  %s3940_s5 = smov [#allocation17]  }
 0x45b   : > { %p3772_p4 = scmp.ne.s32.totalorder %s5328_s7, %s3771_s8  ;;  %s3775_s19 = sshll.u32 %s3940_s5, 4  ;;  %s3776_s19 = int_to_ptr.vmem [resolvable:$false] %s3775_s19 }
 0x45c   : > { %s3777_s25 = scalar_lea.vmem %s3776_s19, 512  ;;  %p3778_p12 = scmp.lt.s32.totalorder %s5328_s7, %s3776_s19 }
 0x45d   : > { %s3099_s21 = sshll.u32 %s5608_s18, 1  ;;  %s3100_s9 = sshll.u32 %s5609_s30, 2 }
 0x45e   : > { %s2781_s17 = sadd.s32 %s3100_s9, %s3099_s21  ;;  %p5612_p3 = scmp.ne.s32.totalorder %s5610_s4, 0 }
 0x45f   : > { %s3101_s15 = sshll.u32 %s2781_s17, 7  ;;  %p3779_p1 = scmp.lt.s32.totalorder %s3777_s25, %s3771_s8 }
 0x460   : > { %s5333_s28 = scalar_lea.hbm %s5611_s23, %s3101_s15  ;;  %p3773_p0 = pnand %p3772_p4, %p5612_p3 }
 0x461   : > { %p3780_p2 = por %p3779_p1, %p3778_p12 }
 0x462   : > { %p3774_p9 = pneg %p3773_p0 }
 0x464   : > { %p3781_p6 = pnand %p3780_p2, %p3774_p9 }
 0x466   : > { %3784 = shalt.err (!%p3781_p6)
}
 0x467   : > { %s3785_s1 = scalar_lea.hbm %s5333_s28, 256  ;;  %s3789_s14 = scalar_lea.hbm %s5611_s23, 1024 }
 0x468   : > { %p3786_p13 = scmp.ne.s32.totalorder %s5333_s28, %s3785_s1  ;;  %p3790_p11 = scmp.lt.u32.totalorder %s5333_s28, %s5611_s23 }
 0x469   : > { %p3791_p8 = scmp.lt.u32.totalorder %s3789_s14, %s3785_s1  ;;  %p3793_p4 = scmp.lt.u32.totalorder %s3785_s1, %s5333_s28 }
 0x46a   : > { %p3787_p10 = pnand %p3786_p13, %p5612_p3 }
 0x46b   : > { %p3792_p7 = por %p3791_p8, %p3790_p11 }
 0x46c   : > { %p3788_p5 = pneg %p3787_p10 }
 0x46d   : > { %p3794_p0 = por %p3793_p4, %p3792_p7 }
 0x46f   : > { %p3795_p9 = pnand %p3794_p0, %p3788_p5 }
 0x471   : > { %3798 = shalt.err (!%p3795_p9)
}
 0x472   : > { %s3941_s30 = smov 128   ;;  %s3942_s21 = smov 8  }
 0x473   : > { %3340 = dma.vmem_to_hbm [thread:$0]  (%p5612_p3), %s5328_s7, 256, %s5333_s28, %s2769_s11, %s3941_s30, %s3941_s30, %s3942_s21  }
 0x474 PF: > { %s5613_s9 = sld [smem:[#allocation33_spill]]  ;;  %s5614_s17 = sld [smem:[#allocation25_spill]] }
 0x475   : > { %s5615_s15 = sld [smem:[#allocation37_spill]] }
 0x47a   : > { %p3374_p12 = scmp.ge.s32.totalorder %s5613_s9, 2  ;;  %s2799_s16 = sand.u32 1, %s5614_s17  }
 0x47b   : > { %p5616_p1 = scmp.ne.s32.totalorder %s5615_s15, 0  ;;  %s2800_s24 = scalar_lea.sflag [#allocation7], %s2799_s16 }
 0x47d   : > { %p3366_p2 = pnand %p3374_p12, %p5616_p1 }
 0x47f   : > { %3872 = dma.done.wait (!%p3366_p2), %s2800_s24, 256  }
 0x480   : > { %3874 = vsyncadd (!%p3366_p2), %s2800_s24, 4294967040  ;;  %s30_s13 = sadd.s32 1, %s5613_s9   ;;  %s5618_s24 = sld [smem:[#allocation24_spill]] }
 0x481   : > { %p5364_p6 = scmp.ge.s32.totalorder %s30_s13, 10   ;;  %s5619_s27 = sld [smem:[#allocation26_spill]] }
 0x482   : > { %s5620_s30 = sld [smem:[#allocation30_spill]]  ;;  %s5621_s4 = sld [smem:[#allocation31_spill]] }
 0x483   : > { %s5622_s9 = sld [smem:[#allocation32_spill]]  ;;  %s5623_s7 = sld [smem:[#allocation41_spill]] }
 0x484   : > { %s5624_s11 = sld [smem:[#allocation42_spill]]  ;;  %s5625_s5 = sld [smem:[#allocation43_spill]] }
 0x485   : > { %s5627_s25 = smov %s3885_s26  ;;  %s5628_s26 = smov %s4287_s10 }
 0x486   : > { %s5629_s28 = smov %s3897_s29  ;;  %s5630_s29 = smov %s4280_s12 }
 0x487   :  { %29 = sbr.rel (!%p5364_p6) target bundleno = 21 (0x15), region = 157 }
 0x488   : > { %s5631_s8 = smov %s5621_s4 }
 0x489   : > { %s5632_s10 = smov %s5623_s7 }
 0x48a   : > { %s5633_s12 = smov %s5625_s5 }
 0x48e   :  { %2805 = vsyncpa [#allocation6], 1 }
 0x48f   :  { %2807 = vsyncpa [#allocation6 + $0x1], 1 }
 0x490   :  { %2808 = vsyncpa [#allocation9], 1 }
 0x491   :  { %2810 = vsyncpa [#allocation9 + $0x1], 1 }
 0x492   :  { %2811 = vsyncpa [#allocation12], 1 }
 0x493   :  { %2813 = vsyncpa [#allocation12 + $0x1], 1 }
 0x494   :  { %2814 = vsyncpa [#allocation15], 1 }
 0x495   :  { %2815 = vsyncpa [#allocation7], 1 }
 0x496   :  { %2817 = vsyncpa [#allocation7 + $0x1], 1 }

</bundles_post_ra>
